<compile_context>
chip_gen: v5e
topology: v5e:2x2
jax: 0.10.0
libtpu: 0.0.40
codegen_flags: <defaults>
</compile_context>

<pallas_src>
import jax
import jax.numpy as jnp
from jax.experimental import pallas as pl
from jax.experimental.pallas import tpu as pltpu

IMG_C, IMG_H, IMG_W = 1, 28, 28
IN_DIM = IMG_C * IMG_H * IMG_W   # 784
H1, H2, OUT = 512, 256, 1
SLOPE = 0.2                      # LeakyReLU negative slope

TB_MAX = 256                     # batch tile (multiple of 16 for bf16 sublanes)


def _round_up(x, m):
    return ((x + m - 1) // m) * m


def _leaky_relu(x):
    # slope in (0, 1): max(x, slope*x) == leaky_relu(x); one VPU max vs cmp+sel.
    return jnp.maximum(x, SLOPE * x)


def discriminator_kernel(x_ref, w1_ref, b1_ref, w2_ref, b2_ref, w3_ref, b3_ref,
                         out_ref):
    # x_ref: (TB, 896) bf16   w1_ref: (896, 512) bf16   b1_ref: (1, 512) f32
    # w2_ref: (512, 256) bf16 b2_ref: (1, 256) f32
    # w3_ref: (1, 256) f32    b3_ref: (1, 1) f32 in SMEM
    x = x_ref[...]

    h1 = jnp.dot(x, w1_ref[...], preferred_element_type=jnp.float32)   # (TB, 512)
    h1 = _leaky_relu(h1 + b1_ref[...])

    h2 = jnp.dot(h1.astype(jnp.bfloat16), w2_ref[...],
                 preferred_element_type=jnp.float32)                    # (TB, 256)
    h2 = _leaky_relu(h2 + b2_ref[...])

    # Final Linear(256, 1): N=1 matmul would waste the MXU and force a
    # lane-width-1 RHS tile; do it as a VPU multiply + lane reduction instead.
    out = jnp.sum(h2 * w3_ref[...], axis=-1, keepdims=True) + b3_ref[0, 0]
    out_ref[...] = out                                                  # (TB, 1)


def discriminator_forward(img, params):
    """img: (B, 1, 28, 28) float32, NCHW. Returns (B, 1) validity scores.

    For WGAN-GP training, concatenate real / fake / interpolated batches along
    the batch axis and make ONE call here — amortizes the resident weight fetch.
    """
    w1, b1, w2, b2, w3, b3 = params
    B = img.shape[0]
    x = img.reshape(B, -1).astype(jnp.float32)            # (B, 784), torch .view

    K_PAD = _round_up(IN_DIM, 128)                        # 784 -> 896 (7*128)
    TB = min(TB_MAX, _round_up(B, 16))                    # bf16 sublane multiple
    B_pad = _round_up(B, TB)

    # Zero-pad batch and K; cast matmul operands to bf16.
    x_p = jnp.pad(x.astype(jnp.bfloat16),
                  ((0, B_pad - B), (0, K_PAD - IN_DIM)))              # (B_pad, 896)
    w1_p = jnp.pad(w1, ((0, K_PAD - IN_DIM), (0, 0))).astype(jnp.bfloat16)  # (896, 512)
    w2_b = w2.astype(jnp.bfloat16)                                    # (512, 256)
    w3_row = w3.reshape(1, H2).astype(jnp.float32)                    # (1, 256)
    b3_s = b3.reshape(1, 1).astype(jnp.float32)                       # SMEM scalar

    grid = (B_pad // TB,)

    out = pl.pallas_call(
        discriminator_kernel,
        out_shape=jax.ShapeDtypeStruct((B_pad, OUT), jnp.float32),
        grid=grid,
        in_specs=[
            # Activations: tiled along batch, pipelined.
            pl.BlockSpec((TB, K_PAD), lambda i: (i, 0)),
            # Weights / biases: same block every step -> VMEM-resident.
            pl.BlockSpec((K_PAD, H1), lambda i: (0, 0)),
            pl.BlockSpec((1, H1),     lambda i: (0, 0)),
            pl.BlockSpec((H1, H2),    lambda i: (0, 0)),
            pl.BlockSpec((1, H2),     lambda i: (0, 0)),
            pl.BlockSpec((1, H2),     lambda i: (0, 0)),
            # Scalar output bias lives in SMEM (no padded VMEM tile / DMA).
            pl.BlockSpec(memory_space=pltpu.MemorySpace.SMEM),
        ],
        out_specs=pl.BlockSpec((TB, OUT), lambda i: (i, 0)),
        compiler_params=pltpu.CompilerParams(
            dimension_semantics=("parallel",),   # megacore sharding on v7x
        ),
    )(x_p, w1_p, b1, w2_b, b2, w3_row, b3_s)

    return out[:B]


def init_params(key):
    """Deterministic init mimicking nn.Linear default: U(-1/sqrt(fan_in), +)."""
    def linear(key, fan_in, fan_out):
        kw, kb = jax.random.split(key)
        bound = 1.0 / jnp.sqrt(fan_in)
        # stored as (in, out) so the kernel does x @ W (torch is (out, in))
        w = jax.random.uniform(kw, (fan_in, fan_out), jnp.float32, -bound, bound)
        b = jax.random.uniform(kb, (1, fan_out), jnp.float32, -bound, bound)
        return w, b

    k1, k2, k3 = jax.random.split(key, 3)
    w1, b1 = linear(k1, IN_DIM, H1)
    w2, b2 = linear(k2, H1, H2)
    w3, b3 = linear(k3, H2, OUT)
    return (w1, b1, w2, b2, w3, b3)


def reference_forward(img, params):
    """Pure-JAX f32 reference for correctness check."""
    w1, b1, w2, b2, w3, b3 = params
    x = img.reshape(img.shape[0], -1)
    h1 = x @ w1 + b1
    h1 = jnp.where(h1 > 0, h1, SLOPE * h1)
    h2 = h1 @ w2 + b2
    h2 = jnp.where(h2 > 0, h2, SLOPE * h2)
    return h2 @ w3 + b3


if __name__ == "__main__":
    key = jax.random.PRNGKey(0)
    k_img, k_params = jax.random.split(key)

    B = 2
    img = jax.random.normal(k_img, (B, IMG_C, IMG_H, IMG_W), jnp.float32)
    params = init_params(k_params)

    out = discriminator_forward(img, params)
    out = jax.block_until_ready(out)

    ref = reference_forward(img, params)
    assert out.shape == (B, 1), out.shape
    # bf16 matmul operands (f32 accumulation): loosen tolerance vs f32 reference.
    assert jnp.allclose(out, ref, atol=5e-2, rtol=5e-2), (out, ref)

    print("KERNEL_OK")
</pallas_src>

<mosaic_0001>
module attributes {stable_mosaic.version = 11 : i64} {
  func.func @discriminator_kernel(%arg0: i32, %arg1: memref<16x896xbf16, #tpu.memory_space<vmem>>, %arg2: memref<896x512xbf16, #tpu.memory_space<vmem>>, %arg3: memref<1x512xf32, #tpu.memory_space<vmem>>, %arg4: memref<512x256xbf16, #tpu.memory_space<vmem>>, %arg5: memref<1x256xf32, #tpu.memory_space<vmem>>, %arg6: memref<1x256xf32, #tpu.memory_space<vmem>>, %arg7: memref<1x1xf32, #tpu.memory_space<smem>>, %arg8: memref<16x1xf32, #tpu.memory_space<vmem>>) attributes {dimension_semantics = [#tpu.dimension_semantics<parallel>], iteration_bounds = array<i64: 1>, scalar_prefetch = 0 : i64, scratch_operands = 0 : i64, tpu.core_type = #tpu.core_type<tc>, window_params = [{transform_indices = @transform_0, window_bounds = array<i64: 16, 896>}, {pipeline_mode = #tpu.pipeline_mode<synchronous>, transform_indices = @transform_1, window_bounds = array<i64: 896, 512>}, {pipeline_mode = #tpu.pipeline_mode<synchronous>, transform_indices = @transform_2, window_bounds = array<i64: 1, 512>}, {pipeline_mode = #tpu.pipeline_mode<synchronous>, transform_indices = @transform_3, window_bounds = array<i64: 512, 256>}, {pipeline_mode = #tpu.pipeline_mode<synchronous>, transform_indices = @transform_4, window_bounds = array<i64: 1, 256>}, {pipeline_mode = #tpu.pipeline_mode<synchronous>, transform_indices = @transform_5, window_bounds = array<i64: 1, 256>}, {transform_indices = @transform_6, window_bounds = array<i64: 1, 1>}, {transform_indices = @transform_7, window_bounds = array<i64: 16, 1>}]} {
    %c0 = arith.constant 0 : index
    %c0_0 = arith.constant 0 : index
    %0 = vector.load %arg1[%c0, %c0_0] : memref<16x896xbf16, #tpu.memory_space<vmem>>, vector<16x896xbf16>
    %c0_1 = arith.constant 0 : index
    %c0_2 = arith.constant 0 : index
    %1 = vector.load %arg2[%c0_1, %c0_2] : memref<896x512xbf16, #tpu.memory_space<vmem>>, vector<896x512xbf16>
    %cst = arith.constant dense<0.000000e+00> : vector<16x512xf32>
    %2 = tpu.matmul %0, %1, %cst {dimension_numbers = #tpu.dot_dimension_numbers<[1], [0], [0], [1], [0, 0, 1, 1], [], []>} : vector<16x896xbf16>, vector<896x512xbf16>, vector<16x512xf32> -> vector<16x512xf32>
    %c0_3 = arith.constant 0 : index
    %c0_4 = arith.constant 0 : index
    %3 = vector.load %arg3[%c0_3, %c0_4] : memref<1x512xf32, #tpu.memory_space<vmem>>, vector<1x512xf32>
    %4 = vector.broadcast %3 : vector<1x512xf32> to vector<16x512xf32>
    %5 = arith.addf %2, %4 : vector<16x512xf32>
    %cst_5 = arith.constant 2.000000e-01 : f32
    %6 = vector.broadcast %cst_5 : f32 to vector<16x512xf32>
    %7 = arith.mulf %6, %5 : vector<16x512xf32>
    %8 = arith.maximumf %5, %7 : vector<16x512xf32>
    %9 = arith.truncf %8 : vector<16x512xf32> to vector<16x512xbf16>
    %c0_6 = arith.constant 0 : index
    %c0_7 = arith.constant 0 : index
    %10 = vector.load %arg4[%c0_6, %c0_7] : memref<512x256xbf16, #tpu.memory_space<vmem>>, vector<512x256xbf16>
    %cst_8 = arith.constant dense<0.000000e+00> : vector<16x256xf32>
    %11 = tpu.matmul %9, %10, %cst_8 {dimension_numbers = #tpu.dot_dimension_numbers<[1], [0], [0], [1], [0, 0, 1, 1], [], []>} : vector<16x512xbf16>, vector<512x256xbf16>, vector<16x256xf32> -> vector<16x256xf32>
    %c0_9 = arith.constant 0 : index
    %c0_10 = arith.constant 0 : index
    %12 = vector.load %arg5[%c0_9, %c0_10] : memref<1x256xf32, #tpu.memory_space<vmem>>, vector<1x256xf32>
    %13 = vector.broadcast %12 : vector<1x256xf32> to vector<16x256xf32>
    %14 = arith.addf %11, %13 : vector<16x256xf32>
    %cst_11 = arith.constant 2.000000e-01 : f32
    %15 = vector.broadcast %cst_11 : f32 to vector<16x256xf32>
    %16 = arith.mulf %15, %14 : vector<16x256xf32>
    %17 = arith.maximumf %14, %16 : vector<16x256xf32>
    %c0_12 = arith.constant 0 : index
    %c0_13 = arith.constant 0 : index
    %18 = vector.load %arg6[%c0_12, %c0_13] : memref<1x256xf32, #tpu.memory_space<vmem>>, vector<1x256xf32>
    %19 = vector.broadcast %18 : vector<1x256xf32> to vector<16x256xf32>
    %20 = arith.mulf %17, %19 : vector<16x256xf32>
    %cst_14 = arith.constant dense<0.000000e+00> : vector<16xf32>
    %21 = vector.multi_reduction <add>, %20, %cst_14 [1] : vector<16x256xf32> to vector<16xf32>
    %22 = vector.shape_cast %21 : vector<16xf32> to vector<16x1xf32>
    %c0_15 = arith.constant 0 : index
    %c0_16 = arith.constant 0 : index
    %23 = memref.load %arg7[%c0_15, %c0_16] : memref<1x1xf32, #tpu.memory_space<smem>>
    %24 = vector.broadcast %23 : f32 to vector<16x1xf32>
    %25 = arith.addf %22, %24 : vector<16x1xf32>
    %c0_17 = arith.constant 0 : index
    %c0_18 = arith.constant 0 : index
    %26 = vector.load %arg8[%c0_17, %c0_18] : memref<16x1xf32, #tpu.memory_space<vmem>>, vector<16x1xf32>
    tpu.vector_store %arg8[%c0_17, %c0_18], %25 {strides = array<i32>} : memref<16x1xf32, #tpu.memory_space<vmem>>, vector<16x1xf32>,
    return
  }
  func.func @transform_0(%arg0: i32) -> (i32, i32) {
    %c0_i32 = arith.constant 0 : i32
    %c0_i32_0 = arith.constant 0 : i32
    return %arg0, %c0_i32 : i32, i32
  }
  func.func @transform_1(%arg0: i32) -> (i32, i32) {
    %c0_i32 = arith.constant 0 : i32
    %c0_i32_0 = arith.constant 0 : i32
    %c0_i32_1 = arith.constant 0 : i32
    return %c0_i32, %c0_i32_0 : i32, i32
  }
  func.func @transform_2(%arg0: i32) -> (i32, i32) {
    %c0_i32 = arith.constant 0 : i32
    %c0_i32_0 = arith.constant 0 : i32
    %c0_i32_1 = arith.constant 0 : i32
    return %c0_i32, %c0_i32_0 : i32, i32
  }
  func.func @transform_3(%arg0: i32) -> (i32, i32) {
    %c0_i32 = arith.constant 0 : i32
    %c0_i32_0 = arith.constant 0 : i32
    %c0_i32_1 = arith.constant 0 : i32
    return %c0_i32, %c0_i32_0 : i32, i32
  }
  func.func @transform_4(%arg0: i32) -> (i32, i32) {
    %c0_i32 = arith.constant 0 : i32
    %c0_i32_0 = arith.constant 0 : i32
    %c0_i32_1 = arith.constant 0 : i32
    return %c0_i32, %c0_i32_0 : i32, i32
  }
  func.func @transform_5(%arg0: i32) -> (i32, i32) {
    %c0_i32 = arith.constant 0 : i32
    %c0_i32_0 = arith.constant 0 : i32
    %c0_i32_1 = arith.constant 0 : i32
    return %c0_i32, %c0_i32_0 : i32, i32
  }
  func.func @transform_6(%arg0: i32) -> (i32, i32) {
    %c0_i32 = arith.constant 0 : i32
    %c0_i32_0 = arith.constant 0 : i32
    %c0_i32_1 = arith.constant 0 : i32
    return %c0_i32, %c0_i32_0 : i32, i32
  }
  func.func @transform_7(%arg0: i32) -> (i32, i32) {
    %c0_i32 = arith.constant 0 : i32
    %c0_i32_0 = arith.constant 0 : i32
    return %arg0, %c0_i32 : i32, i32
  }
}

</mosaic_0001>

<bundles_post_ra>
// kernel: tpu_custom_call.1
= control target key start
LH: loop header
LB: loop body
LE: loop exit
PB: predicated region body
PF: predicated region fallthrough
CT: control target
= control target key end

     0   :  { %13 = vsyncpa [#allocation4], 0  ;;  %s4163_s0 = inlined_call_operand.hbm [shape: bf16[16,896], index: 0, kind: input, shape index: {}]   ;;  %s4164_s1 = inlined_call_operand.hbm [shape: bf16[896,512], index: 1, kind: input, shape index: {}]   ;;  %s4165_s2 = inlined_call_operand.hbm [shape: f32[1,512], index: 2, kind: input, shape index: {}]   ;;  %s4166_s3 = inlined_call_operand.hbm [shape: bf16[512,256], index: 3, kind: input, shape index: {}]   ;;  %s4167_s4 = inlined_call_operand.vmem [shape: f32[1,256], index: 4, kind: input, shape index: {}]   ;;  %s4168_s5 = inlined_call_operand.vmem [shape: f32[1,256], index: 5, kind: input, shape index: {}]   ;;  %s4169_s6 = inlined_call_operand.<no memory space> [shape: f32[1,1], index: 6, kind: input, shape index: {}]   ;;  %s4170_s7 = inlined_call_operand.vmem [shape: f32[16,1], index: 7, kind: output, shape index: {}]  }
   0x1   :  { %14 = vsyncpa [#allocation6], 0  ;;  %s33_s26 = sshll.u32 %s4164_s1, 4  ;;  %s34_s26 = int_to_ptr.hbm [resolvable:$true] %s33_s26 }
   0x2   :  { %15 = vsyncpa [#allocation9], 0  ;;  %s4025_s27 = smov [#allocation5]   ;;  %s20_s8 = sshll.u32 %s4163_s0, 4  ;;  %s21_s8 = int_to_ptr.hbm [resolvable:$true] %s20_s8 }
   0x3   :  { %s35_s28 = sshll.u32 %s4025_s27, 4  ;;  %s4026_s9 = smov 256   ;;  %s36_s28 = int_to_ptr.vmem [resolvable:$true] %s35_s28 }
   0x4   :  { %s4027_s10 = smov 16   ;;  %s4028_s11 = smov [#allocation3]  }
   0x5   :  { %41 = dma.hbm_to_vmem [thread:$0]  %s34_s26, 28672, %s36_s28, [#allocation6], %s4026_s9, %s4026_s9, %s4027_s10  }
   0x6   :  { %s22_s12 = sshll.u32 %s4028_s11, 4  ;;  %s4029_s13 = smov 448   ;;  %s23_s12 = int_to_ptr.vmem [resolvable:$true] %s22_s12 }
   0x7   :  { %s4030_s14 = smov 28   ;;  %s47_s16 = sshll.u32 %s4165_s2, 4  ;;  %s48_s16 = int_to_ptr.hbm [resolvable:$true] %s47_s16 }
   0x8   :  { %28 = dma.hbm_to_vmem [thread:$0]  %s21_s8, 896, %s23_s12, [#allocation4], %s4029_s13, %s4029_s13, %s4030_s14  }
   0x9   :  { %s4031_s17 = smov [#allocation7]   ;;  %s57_s20 = sshll.u32 %s4166_s3, 4  ;;  %s58_s20 = int_to_ptr.hbm [resolvable:$true] %s57_s20 }
   0xa   :  { %s49_s18 = sshll.u32 %s4031_s17, 4  ;;  %s4032_s21 = smov [#allocation8]   ;;  %s50_s18 = int_to_ptr.vmem [resolvable:$true] %s49_s18 }
   0xb   :  { %52 = dma.hbm_to_vmem [thread:$0]  %s48_s16, 64, %s50_s18, [#allocation6]  }
   0xc   :  { %s59_s22 = sshll.u32 %s4032_s21, 4  ;;  %s4033_s23 = smov 128   ;;  %s60_s22 = int_to_ptr.vmem [resolvable:$true] %s59_s22 }
   0xd   :  { %s4034_s24 = smov 8  }
   0xe   :  { %65 = dma.hbm_to_vmem [thread:$0]  %s58_s20, 8192, %s60_s22, [#allocation9], %s4033_s23, %s4033_s23, %s4034_s24  }
   0xf   :  { %4019 = dma.done.wait [#allocation4], 896  }
  0x10   :  { %4020 = vsyncadd [#allocation4], 4294966400 }
  0x11   :  { %4021 = dma.done.wait [#allocation6], 28736  }
  0x12   :  { %4022 = vsyncadd [#allocation6], 4294938560 }
  0x13   :  { %4023 = dma.done.wait [#allocation9], 8192  }
  0x14   :  { %4024 = vsyncadd [#allocation9], 4294959104  ;;  %v2580_v0 = vld [vmem:[#allocation5 + $0xe0] sm:$0xf]  ;;  %v3655_v1 = vld [vmem:[#allocation5 + $0xec] sm:$0xf0] }
  0x15   :  { %v2708_v2 = vld [vmem:[#allocation5 + $0x1e0] sm:$0xf]  ;;  %v2581_v3 = vor.u32 %v3655_v1, %v2580_v0  ;;  %v3687_v4 = vld [vmem:[#allocation5 + $0x1ec] sm:$0xf0]  ;;  %vm2428_vm0 = vcmask 7168  }
  0x16   :  { %v2836_v5 = vld [vmem:[#allocation5 + $0x2e0] sm:$0xf]  ;;  %v3719_v6 = vld [vmem:[#allocation5 + $0x2ec] sm:$0xf0]  ;;  %v2709_v7 = vor.u32 %v3687_v4, %v2708_v2 }
  0x17   :  { %v2837_v8 = vor.u32 %v3719_v6, %v2836_v5  ;;  %v2964_v9 = vld [vmem:[#allocation5 + $0x3e0] sm:$0xf]  ;;  %v3751_v10 = vld [vmem:[#allocation5 + $0x3ec] sm:$0xf0]  ;;  %1486 = vmatpush.bf16.msra.mxu0 %v2581_v3 }
  0x18   :  { %v2564_v11 = vld [vmem:[#allocation5 + $0xc0] sm:$0xf]  ;;  %v2965_v12 = vor.u32 %v3751_v10, %v2964_v9  ;;  %v3651_v13 = vld [vmem:[#allocation5 + $0xcc] sm:$0xf0]  ;;  %1500 = vmatpush.bf16.msra.mxu1 %v2709_v7 }
  0x19   :  { %v2692_v14 = vld [vmem:[#allocation5 + $0x1c0] sm:$0xf]  ;;  %v3683_v15 = vld [vmem:[#allocation5 + $0x1cc] sm:$0xf0]  ;;  %1514 = vmatpush.bf16.msra.mxu2 %v2837_v8  ;;  %v2565_v16 = vor.u32 %v3651_v13, %v2564_v11 }
  0x1a   :  { %v2693_v17 = vor.u32 %v3683_v15, %v2692_v14  ;;  %v2820_v18 = vld [vmem:[#allocation5 + $0x2c0] sm:$0xf]  ;;  %v3715_v19 = vld [vmem:[#allocation5 + $0x2cc] sm:$0xf0]  ;;  %1528 = vmatpush.bf16.msra.mxu3 %v2965_v12 }
  0x1b   :  { %v2948_v20 = vld [vmem:[#allocation5 + $0x3c0] sm:$0xf]  ;;  %v2821_v21 = vor.u32 %v3715_v19, %v2820_v18  ;;  %v3747_v22 = vld [vmem:[#allocation5 + $0x3cc] sm:$0xf0]  ;;  %1487 = vmatpush.bf16.msra.mxu0 %v2565_v16 }
  0x1c   :  { %v2548_v23 = vld [vmem:[#allocation5 + $0xa0] sm:$0xf]  ;;  %v3647_v24 = vld [vmem:[#allocation5 + $0xac] sm:$0xf0]  ;;  %v2949_v25 = vor.u32 %v3747_v22, %v2948_v20  ;;  %1501 = vmatpush.bf16.msra.mxu1 %v2693_v17 }
  0x1d   :  { %v2676_v26 = vld [vmem:[#allocation5 + $0x1a0] sm:$0xf]  ;;  %v3679_v27 = vld [vmem:[#allocation5 + $0x1ac] sm:$0xf0]  ;;  %v2549_v29 = vor.u32 %v3647_v24, %v2548_v23  ;;  %1515 = vmatpush.bf16.msra.mxu2 %v2821_v21 }
  0x1e   :  { %v2804_v28 = vld [vmem:[#allocation5 + $0x2a0] sm:$0xf]  ;;  %v3711_v30 = vld [vmem:[#allocation5 + $0x2ac] sm:$0xf0]  ;;  %v2677_v33 = vor.u32 %v3679_v27, %v2676_v26  ;;  %1529 = vmatpush.bf16.msra.mxu3 %v2949_v25 }
  0x1f   :  { %v2932_v31 = vld [vmem:[#allocation5 + $0x3a0] sm:$0xf]  ;;  %v3743_v32 = vld [vmem:[#allocation5 + $0x3ac] sm:$0xf0]  ;;  %v2805_v34 = vor.u32 %v3711_v30, %v2804_v28  ;;  %1488 = vmatpush.bf16.msra.mxu0 %v2549_v29 }
  0x20   :  { %v2532_v35 = vld [vmem:[#allocation5 + $0x80] sm:$0xf]  ;;  %v3643_v36 = vld [vmem:[#allocation5 + $0x8c] sm:$0xf0]  ;;  %v2933_v38 = vor.u32 %v3743_v32, %v2932_v31  ;;  %1502 = vmatpush.bf16.msra.mxu1 %v2677_v33 }
  0x21   :  { %v2660_v37 = vld [vmem:[#allocation5 + $0x180] sm:$0xf]  ;;  %v3675_v39 = vld [vmem:[#allocation5 + $0x18c] sm:$0xf0]  ;;  %v2533_v44 = vor.u32 %v3643_v36, %v2532_v35  ;;  %1516 = vmatpush.bf16.msra.mxu2 %v2805_v34 }
  0x22   :  { %v2788_v40 = vld [vmem:[#allocation5 + $0x280] sm:$0xf]  ;;  %v3707_v41 = vld [vmem:[#allocation5 + $0x28c] sm:$0xf0]  ;;  %v2661_v45 = vor.u32 %v3675_v39, %v2660_v37  ;;  %1530 = vmatpush.bf16.msra.mxu3 %v2933_v38  ;;  %v3653_v37 = vld [vmem:[#allocation5 + $0xe4] sm:$0xf] }
  0x23   :  { %v2916_v42 = vld [vmem:[#allocation5 + $0x380] sm:$0xf]  ;;  %v3739_v43 = vld [vmem:[#allocation5 + $0x38c] sm:$0xf0]  ;;  %v2789_v46 = vor.u32 %v3707_v41, %v2788_v40  ;;  %1489 = vmatpush.bf16.msra.mxu0 %v2533_v44  ;;  %v2582_v38 = vld [vmem:[#allocation5 + $0xf0] sm:$0xf0] }
  0x24   :  { %v2516_v47 = vld [vmem:[#allocation5 + $0x60] sm:$0xf]  ;;  %v3639_v48 = vld [vmem:[#allocation5 + $0x6c] sm:$0xf0]  ;;  %v2917_v50 = vor.u32 %v3739_v43, %v2916_v42  ;;  %1503 = vmatpush.bf16.msra.mxu1 %v2661_v45 }
  0x25   :  { %v2644_v49 = vld [vmem:[#allocation5 + $0x160] sm:$0xf]  ;;  %v3671_v51 = vld [vmem:[#allocation5 + $0x16c] sm:$0xf0]  ;;  %v2517_v56 = vor.u32 %v3639_v48, %v2516_v47  ;;  %1517 = vmatpush.bf16.msra.mxu2 %v2789_v46  ;;  %v2585_v48 = vor.u32 %v3653_v37, %v2582_v38 }
  0x26   :  { %v2772_v52 = vld [vmem:[#allocation5 + $0x260] sm:$0xf]  ;;  %v3703_v53 = vld [vmem:[#allocation5 + $0x26c] sm:$0xf0]  ;;  %v2645_v57 = vor.u32 %v3671_v51, %v2644_v49  ;;  %1531 = vmatpush.bf16.msra.mxu3 %v2917_v50  ;;  %v3649_v50 = vld [vmem:[#allocation5 + $0xc4] sm:$0xf] }
  0x27   :  { %v2900_v54 = vld [vmem:[#allocation5 + $0x360] sm:$0xf]  ;;  %v3735_v55 = vld [vmem:[#allocation5 + $0x36c] sm:$0xf0]  ;;  %v2773_v58 = vor.u32 %v3703_v53, %v2772_v52  ;;  %1490 = vmatpush.bf16.msra.mxu0 %v2517_v56  ;;  %v2566_v51 = vld [vmem:[#allocation5 + $0xd0] sm:$0xf0] }
  0x28   :  { %v2500_v59 = vld [vmem:[#allocation5 + $0x40] sm:$0xf]  ;;  %v3635_v60 = vld [vmem:[#allocation5 + $0x4c] sm:$0xf0]  ;;  %v2901_v62 = vor.u32 %v3735_v55, %v2900_v54  ;;  %1504 = vmatpush.bf16.msra.mxu1 %v2645_v57  ;;  %v2440_v52 = vld [vmem:[#allocation3] sm:$0xf] }
  0x29   :  { %v2628_v61 = vld [vmem:[#allocation5 + $0x140] sm:$0xf]  ;;  %v3667_v63 = vld [vmem:[#allocation5 + $0x14c] sm:$0xf0]  ;;  %v2501_v4 = vor.u32 %v3635_v60, %v2500_v59  ;;  %1518 = vmatpush.bf16.msra.mxu2 %v2773_v58  ;;  %v3621_v53 = vld [vmem:[#allocation3 + $0x18] sm:$0xf0] }
  0x2a   :  { %v2756_v0 = vld [vmem:[#allocation5 + $0x240] sm:$0xf]  ;;  %v3699_v1 = vld [vmem:[#allocation5 + $0x24c] sm:$0xf0]  ;;  %v2629_v5 = vor.u32 %v3667_v63, %v2628_v61  ;;  %1532 = vmatpush.bf16.msra.mxu3 %v2901_v62  ;;  %v4087_v57 = vor.u32 %v3621_v53, %v2440_v52  ;;  %v3622_v58 = vld [vmem:[#allocation3 + $0x20] sm:$0xf0] }
  0x2b   :  { %v2884_v2 = vld [vmem:[#allocation5 + $0x340] sm:$0xf]  ;;  %v3731_v3 = vld [vmem:[#allocation5 + $0x34c] sm:$0xf0]  ;;  %v2757_v6 = vor.u32 %v3699_v1, %v2756_v0  ;;  %1491 = vmatpush.bf16.msra.mxu0 %v2501_v4  ;;  %v2569_v1 = vor.u32 %v3649_v50, %v2566_v51  ;;  %v3645_v4 = vld [vmem:[#allocation5 + $0xa4] sm:$0xf] }
  0x2c   :  { %v2484_v7 = vld [vmem:[#allocation5 + $0x20] sm:$0xf]  ;;  %v3631_v8 = vld [vmem:[#allocation5 + $0x2c] sm:$0xf0]  ;;  %v2885_v10 = vor.u32 %v3731_v3, %v2884_v2  ;;  %1505 = vmatpush.bf16.msra.mxu1 %v2629_v5  ;;  %v2550_v5 = vld [vmem:[#allocation5 + $0xb0] sm:$0xf0] }
  0x2d   :  { %v2612_v9 = vld [vmem:[#allocation5 + $0x120] sm:$0xf]  ;;  %v3663_v11 = vld [vmem:[#allocation5 + $0x12c] sm:$0xf0]  ;;  %v2485_v16 = vor.u32 %v3631_v8, %v2484_v7  ;;  %1519 = vmatpush.bf16.msra.mxu2 %v2757_v6  ;;  %v3618_v6 = vld [vmem:[#allocation3 + $0x4] sm:$0xf] }
  0x2e   :  { %v2740_v12 = vld [vmem:[#allocation5 + $0x220] sm:$0xf]  ;;  %v3695_v13 = vld [vmem:[#allocation5 + $0x22c] sm:$0xf0]  ;;  %v2613_v19 = vor.u32 %v3663_v11, %v2612_v9  ;;  %1533 = vmatpush.bf16.msra.mxu3 %v2885_v10  ;;  %v2442_v7 = vld [vmem:[#allocation3 + $0x1c] sm:$0xf0] }
  0x2f   :  { %v2868_v14 = vld [vmem:[#allocation5 + $0x320] sm:$0xf]  ;;  %v3727_v15 = vld [vmem:[#allocation5 + $0x32c] sm:$0xf0]  ;;  %v2741_v20 = vor.u32 %v3695_v13, %v2740_v12  ;;  %1492 = vmatpush.bf16.msra.mxu0 %v2485_v16  ;;  %v4093_v11 = vor.u32 %v3618_v6, %v2442_v7  ;;  %v3625_v7 = vld [vmem:[#allocation5 + $0x4] sm:$0xf] }
  0x30   :  { %v2468_v17 = vld [vmem:[#allocation5] sm:$0xf]  ;;  %v3627_v18 = vld [vmem:[#allocation5 + $0xc] sm:$0xf0]  ;;  %v2869_v24 = vor.u32 %v3727_v15, %v2868_v14  ;;  %1506 = vmatpush.bf16.msra.mxu1 %v2613_v19  ;;  %v3619_v19 = vld [vmem:[#allocation3 + $0xc] sm:$0xf] }
  0x31   :  { %v2596_v21 = vld [vmem:[#allocation5 + $0x100] sm:$0xf]  ;;  %v3659_v22 = vld [vmem:[#allocation5 + $0x10c] sm:$0xf0]  ;;  %v2469_v31 = vor.u32 %v3627_v18, %v2468_v17  ;;  %1520 = vmatpush.bf16.msra.mxu2 %v2741_v20  ;;  %v2553_v17 = vor.u32 %v3645_v4, %v2550_v5 }
  0x32   :  { %v2724_v23 = vld [vmem:[#allocation5 + $0x200] sm:$0xf]  ;;  %v3691_v25 = vld [vmem:[#allocation5 + $0x20c] sm:$0xf0]  ;;  %v2597_v35 = vor.u32 %v3659_v22, %v2596_v21  ;;  %1534 = vmatpush.bf16.msra.mxu3 %v2869_v24  ;;  %v3641_v21 = vld [vmem:[#allocation5 + $0x84] sm:$0xf] }
  0x33   :  { %v2852_v26 = vld [vmem:[#allocation5 + $0x300] sm:$0xf]  ;;  %v3723_v27 = vld [vmem:[#allocation5 + $0x30c] sm:$0xf0]  ;;  %v2725_v36 = vor.u32 %v3691_v25, %v2724_v23  ;;  %1493 = vmatpush.bf16.msra.mxu0 %v2469_v31  ;;  %v2534_v22 = vld [vmem:[#allocation5 + $0x90] sm:$0xf0] }
  0x34   :  { %v3092_v28 = vld [vmem:[#allocation5 + $0x4e0] sm:$0xf]  ;;  %v3783_v29 = vld [vmem:[#allocation5 + $0x4ec] sm:$0xf0]  ;;  %v2853_v39 = vor.u32 %v3723_v27, %v2852_v26  ;;  %1507 = vmatpush.bf16.msra.mxu1 %v2597_v35  ;;  %v2518_v35 = vld [vmem:[#allocation5 + $0x70] sm:$0xf0] }
  0x35   :  { %v3220_v30 = vld [vmem:[#allocation5 + $0x5e0] sm:$0xf]  ;;  %v3815_v32 = vld [vmem:[#allocation5 + $0x5ec] sm:$0xf0]  ;;  %v3093_v40 = vor.u32 %v3783_v29, %v3092_v28  ;;  %1521 = vmatpush.bf16.msra.mxu2 %v2725_v36 }
  0x36   :  { %v3348_v33 = vld [vmem:[#allocation5 + $0x6e0] sm:$0xf]  ;;  %v3847_v34 = vld [vmem:[#allocation5 + $0x6ec] sm:$0xf0]  ;;  %v3221_v43 = vor.u32 %v3815_v32, %v3220_v30  ;;  %1535 = vmatpush.bf16.msra.mxu3 %v2853_v39  ;;  %1494 = vmatmul.bf16.vlgmr.msra.gmra.mxu0 %v4087_v57  ;;  %v2537_v30 = vor.u32 %v3641_v21, %v2534_v22  ;;  %v2456_v22 = vld [vmem:[#allocation3 + $0x10] sm:$0xf] }
  0x37   :  { %v3076_v41 = vld [vmem:[#allocation5 + $0x4c0] sm:$0xf]  ;;  %v3779_v42 = vld [vmem:[#allocation5 + $0x4cc] sm:$0xf0]  ;;  %v3349_v44 = vor.u32 %v3847_v34, %v3348_v33  ;;  %1542 = vmatpush.bf16.msrb.mxu0 %v3093_v40  ;;  %1508 = vmatmul.bf16.vlgmr.msra.gmra.mxu1 %v4093_v11  ;;  %v3637_v34 = vld [vmem:[#allocation5 + $0x64] sm:$0xf] }
  0x38   :  { %v3204_v45 = vld [vmem:[#allocation5 + $0x5c0] sm:$0xf]  ;;  %v3811_v46 = vld [vmem:[#allocation5 + $0x5cc] sm:$0xf0]  ;;  %v3077_v55 = vor.u32 %v3779_v42, %v3076_v41  ;;  %1556 = vmatpush.bf16.msrb.mxu1 %v3221_v43  ;;  %v2521_v42 = vor.u32 %v3637_v34, %v2518_v35  ;;  %v2694_v34 = vld [vmem:[#allocation5 + $0x1d0] sm:$0xf0] }
  0x39   :  { %v3332_v47 = vld [vmem:[#allocation5 + $0x6c0] sm:$0xf]  ;;  %v3843_v49 = vld [vmem:[#allocation5 + $0x6cc] sm:$0xf0]  ;;  %1570 = vmatpush.bf16.msrb.mxu2 %v3349_v44  ;;  %v3205_v59 = vor.u32 %v3811_v46, %v3204_v45  ;;  %v3633_v46 = vld [vmem:[#allocation5 + $0x44] sm:$0xf] }
  0x3a   :  { %v2448_v54 = vld [vmem:[#allocation3 + $0x8] sm:$0xf]  ;;  %v3060_v56 = vld [vmem:[#allocation5 + $0x4a0] sm:$0xf]  ;;  %v3333_v60 = vor.u32 %v3843_v49, %v3332_v47  ;;  %1584 = vmatpush.bf16.msrb.mxu3 %v2585_v48  ;;  %v2502_v47 = vld [vmem:[#allocation5 + $0x50] sm:$0xf0] }
  0x3b   :  { %v3775_v61 = vld [vmem:[#allocation5 + $0x4ac] sm:$0xf0]  ;;  %v3188_v62 = vld [vmem:[#allocation5 + $0x5a0] sm:$0xf]  ;;  %v4089_v0 = vor.u32 %v3622_v58, %v2448_v54  ;;  %1543 = vmatpush.bf16.msrb.mxu0 %v3077_v55  ;;  %v2505_v54 = vor.u32 %v3633_v46, %v2502_v47  ;;  %v3713_v35 = vld [vmem:[#allocation5 + $0x2c4] sm:$0xf] }
  0x3c   :  { %v3807_v63 = vld [vmem:[#allocation5 + $0x5ac] sm:$0xf0]  ;;  %v3316_v2 = vld [vmem:[#allocation5 + $0x6a0] sm:$0xf]  ;;  %v3061_v8 = vor.u32 %v3775_v61, %v3060_v56  ;;  %1557 = vmatpush.bf16.msrb.mxu1 %v3205_v59  ;;  %v3629_v59 = vld [vmem:[#allocation5 + $0x24] sm:$0xf] }
  0x3d   :  { %v3839_v3 = vld [vmem:[#allocation5 + $0x6ac] sm:$0xf0]  ;;  %1522 = vmatmul.bf16.vlgmr.msra.gmra.mxu2 %v4089_v0  ;;  %v3044_v9 = vld [vmem:[#allocation5 + $0x480] sm:$0xf]  ;;  %v3189_v12 = vor.u32 %v3807_v63, %v3188_v62 }
  0x3e   :  { %v3771_v10 = vld [vmem:[#allocation5 + $0x48c] sm:$0xf0]  ;;  %1571 = vmatpush.bf16.msrb.mxu2 %v3333_v60  ;;  %v3317_v13 = vor.u32 %v3839_v3, %v3316_v2  ;;  %v3172_v14 = vld [vmem:[#allocation5 + $0x580] sm:$0xf]  ;;  %1585 = vmatpush.bf16.msrb.mxu3 %v2569_v1  ;;  %v2486_v60 = vld [vmem:[#allocation5 + $0x30] sm:$0xf0] }
  0x3f   :  { %v3803_v15 = vld [vmem:[#allocation5 + $0x58c] sm:$0xf0]  ;;  %v3300_v16 = vld [vmem:[#allocation5 + $0x680] sm:$0xf]  ;;  %1544 = vmatpush.bf16.msrb.mxu0 %v3061_v8  ;;  %v3045_v24 = vor.u32 %v3771_v10, %v3044_v9  ;;  %v2489_v8 = vor.u32 %v3629_v59, %v2486_v60  ;;  %v2470_v9 = vld [vmem:[#allocation5 + $0x10] sm:$0xf0] }
  0x40   :  { %v3835_v18 = vld [vmem:[#allocation5 + $0x68c] sm:$0xf0]  ;;  %1558 = vmatpush.bf16.msrb.mxu1 %v3189_v12  ;;  %v3173_v25 = vor.u32 %v3803_v15, %v3172_v14  ;;  %v3028_v27 = vld [vmem:[#allocation5 + $0x460] sm:$0xf]  ;;  %v3685_v10 = vld [vmem:[#allocation5 + $0x1e4] sm:$0xf] }
  0x41   :  { %v2450_v20 = vld [vmem:[#allocation3 + $0x24] sm:$0xf0]  ;;  %v3301_v26 = vor.u32 %v3835_v18, %v3300_v16  ;;  %v3156_v29 = vld [vmem:[#allocation5 + $0x560] sm:$0xf]  ;;  %v2710_v12 = vld [vmem:[#allocation5 + $0x1f0] sm:$0xf0] }
  0x42   :  { %v4096_v23 = vor.u32 %v3619_v19, %v2450_v20  ;;  %1572 = vmatpush.bf16.msrb.mxu2 %v3317_v13  ;;  %v3767_v28 = vld [vmem:[#allocation5 + $0x46c] sm:$0xf0]  ;;  %1586 = vmatpush.bf16.msrb.mxu3 %v2553_v17  ;;  %v3284_v32 = vld [vmem:[#allocation5 + $0x660] sm:$0xf]  ;;  %v3717_v13 = vld [vmem:[#allocation5 + $0x2e4] sm:$0xf] }
  0x43   :  { %v3799_v31 = vld [vmem:[#allocation5 + $0x56c] sm:$0xf0]  ;;  %1545 = vmatpush.bf16.msrb.mxu0 %v3045_v24  ;;  %v3029_v36 = vor.u32 %v3767_v28, %v3028_v27  ;;  %v3012_v39 = vld [vmem:[#allocation5 + $0x440] sm:$0xf]  ;;  %v2838_v14 = vld [vmem:[#allocation5 + $0x2f0] sm:$0xf0]  ;;  %v2713_v27 = vor.u32 %v3685_v10, %v2710_v12 }
  0x44   :  { %v3831_v33 = vld [vmem:[#allocation5 + $0x66c] sm:$0xf0]  ;;  %1536 = vmatmul.bf16.vlgmr.msra.gmra.mxu3 %v4096_v23  ;;  %1559 = vmatpush.bf16.msrb.mxu1 %v3173_v25  ;;  %v3157_v37 = vor.u32 %v3799_v31, %v3156_v29  ;;  %v3140_v41 = vld [vmem:[#allocation5 + $0x540] sm:$0xf]  ;;  %v3749_v15 = vld [vmem:[#allocation5 + $0x3e4] sm:$0xf]  ;;  %v2841_v31 = vor.u32 %v3717_v13, %v2838_v14 }
  0x45   :  { %v3285_v38 = vor.u32 %v3831_v33, %v3284_v32  ;;  %v3763_v40 = vld [vmem:[#allocation5 + $0x44c] sm:$0xf0]  ;;  %v3268_v44 = vld [vmem:[#allocation5 + $0x640] sm:$0xf]  ;;  %v2966_v17 = vld [vmem:[#allocation5 + $0x3f0] sm:$0xf0] }
  0x46   :  { %1573 = vmatpush.bf16.msrb.mxu2 %v3301_v26  ;;  %1587 = vmatpush.bf16.msrb.mxu3 %v2537_v30  ;;  %v3795_v43 = vld [vmem:[#allocation5 + $0x54c] sm:$0xf0]  ;;  %v3013_v48 = vor.u32 %v3763_v40, %v3012_v39  ;;  %v2996_v51 = vld [vmem:[#allocation5 + $0x420] sm:$0xf]  ;;  %v3781_v18 = vld [vmem:[#allocation5 + $0x4e4] sm:$0xf]  ;;  %v2473_v26 = vor.u32 %v3625_v7, %v2470_v9  ;;  %v2969_v32 = vor.u32 %v3749_v15, %v2966_v17 }
  0x47   :  { %v3827_v45 = vld [vmem:[#allocation5 + $0x64c] sm:$0xf0]  ;;  %1546 = vmatpush.bf16.msrb.mxu0 %v3029_v36  ;;  %v3141_v49 = vor.u32 %v3795_v43, %v3140_v41  ;;  %v3124_v53 = vld [vmem:[#allocation5 + $0x520] sm:$0xf]  ;;  %v3094_v19 = vld [vmem:[#allocation5 + $0x4f0] sm:$0xf0] }
  0x48   :  { %1560 = vmatpush.bf16.msrb.mxu1 %v3157_v37  ;;  %v3269_v50 = vor.u32 %v3827_v45, %v3268_v44  ;;  %v3759_v52 = vld [vmem:[#allocation5 + $0x42c] sm:$0xf0]  ;;  %v3252_v56 = vld [vmem:[#allocation5 + $0x620] sm:$0xf]  ;;  %v3623_v24 = vld [vmem:[#allocation3 + $0x28] sm:$0xf0]  ;;  %v3097_v36 = vor.u32 %v3781_v18, %v3094_v19 }
  0x49   :  { %v3791_v55 = vld [vmem:[#allocation5 + $0x52c] sm:$0xf0]  ;;  %v2980_v61 = vld [vmem:[#allocation5 + $0x400] sm:$0xf]  ;;  %v2997_v62 = vor.u32 %v3759_v52, %v2996_v51  ;;  %v3624_v28 = vld [vmem:[#allocation3 + $0x30] sm:$0xf0]  ;;  %v4099_v37 = vor.u32 %v3623_v24, %v2456_v22 }
  0x4a   :  { %1574 = vmatpush.bf16.msrb.mxu2 %v3285_v38  ;;  %1588 = vmatpush.bf16.msrb.mxu3 %v2521_v42  ;;  %v3823_v58 = vld [vmem:[#allocation5 + $0x62c] sm:$0xf0]  ;;  %v3108_v1 = vld [vmem:[#allocation5 + $0x500] sm:$0xf]  ;;  %v3125_v3 = vor.u32 %v3791_v55, %v3124_v53  ;;  %v3620_v29 = vld [vmem:[#allocation3 + $0x14] sm:$0xf] }
  0x4b   :  { %1547 = vmatpush.bf16.msrb.mxu0 %v3013_v48  ;;  %v3755_v63 = vld [vmem:[#allocation5 + $0x40c] sm:$0xf0]  ;;  %v3253_v4 = vor.u32 %v3823_v58, %v3252_v56  ;;  %v3236_v5 = vld [vmem:[#allocation5 + $0x600] sm:$0xf]  ;;  %v2458_v30 = vld [vmem:[#allocation3 + $0x2c] sm:$0xf0] }
  0x4c   :  { %v3787_v2 = vld [vmem:[#allocation5 + $0x50c] sm:$0xf0]  ;;  %1561 = vmatpush.bf16.msrb.mxu1 %v3141_v49  ;;  %v2981_v16 = vor.u32 %v3755_v63, %v2980_v61  ;;  %v2464_v25 = vld [vmem:[#allocation3 + $0x18] sm:$0xf]  ;;  %v3681_v33 = vld [vmem:[#allocation5 + $0x1c4] sm:$0xf]  ;;  %v4103_v42 = vor.u32 %v3620_v29, %v2458_v30 }
  0x4d   :  { %v3819_v6 = vld [vmem:[#allocation5 + $0x60c] sm:$0xf0]  ;;  %v3109_v20 = vor.u32 %v3787_v2, %v3108_v1  ;;  %v2822_v38 = vld [vmem:[#allocation5 + $0x2d0] sm:$0xf0]  ;;  %v3745_v39 = vld [vmem:[#allocation5 + $0x3c4] sm:$0xf]  ;;  %v4101_v41 = vor.u32 %v3624_v28, %v2464_v25  ;;  %v2697_v45 = vor.u32 %v3681_v33, %v2694_v34 }
  0x4e   :  { %1575 = vmatpush.bf16.msrb.mxu2 %v3269_v50  ;;  %1589 = vmatpush.bf16.msrb.mxu3 %v2505_v54  ;;  %v3237_v21 = vor.u32 %v3819_v6, %v3236_v5  ;;  %v2950_v40 = vld [vmem:[#allocation5 + $0x3d0] sm:$0xf0]  ;;  %v3777_v43 = vld [vmem:[#allocation5 + $0x4c4] sm:$0xf]  ;;  %v2825_v46 = vor.u32 %v3713_v35, %v2822_v38 }
  0x4f   :  { %1548 = vmatpush.bf16.msrb.mxu0 %v2997_v62  ;;  %v3078_v44 = vld [vmem:[#allocation5 + $0x4d0] sm:$0xf0]  ;;  %v2953_v47 = vor.u32 %v3745_v39, %v2950_v40  ;;  %v3677_v48 = vld [vmem:[#allocation5 + $0x1a4] sm:$0xf] }
  0x50   :  { %1562 = vmatpush.bf16.msrb.mxu1 %v3125_v3  ;;  %v2678_v49 = vld [vmem:[#allocation5 + $0x1b0] sm:$0xf0]  ;;  %v3709_v50 = vld [vmem:[#allocation5 + $0x2a4] sm:$0xf]  ;;  %v3081_v51 = vor.u32 %v3777_v43, %v3078_v44 }
  0x51   :  { %v2806_v52 = vld [vmem:[#allocation5 + $0x2b0] sm:$0xf0]  ;;  %v3741_v53 = vld [vmem:[#allocation5 + $0x3a4] sm:$0xf]  ;;  %v2681_v58 = vor.u32 %v3677_v48, %v2678_v49 }
  0x52   :  { %1576 = vmatpush.bf16.msrb.mxu2 %v3253_v4  ;;  %1590 = vmatpush.bf16.msrb.mxu3 %v2489_v8  ;;  %v2934_v54 = vld [vmem:[#allocation5 + $0x3b0] sm:$0xf0]  ;;  %v3773_v55 = vld [vmem:[#allocation5 + $0x4a4] sm:$0xf]  ;;  %v2809_v59 = vor.u32 %v3709_v50, %v2806_v52 }
  0x53   :  { %1549 = vmatpush.bf16.msrb.mxu0 %v2981_v16  ;;  %v3062_v56 = vld [vmem:[#allocation5 + $0x4b0] sm:$0xf0]  ;;  %v2937_v60 = vor.u32 %v3741_v53, %v2934_v54  ;;  %v3673_v61 = vld [vmem:[#allocation5 + $0x184] sm:$0xf] }
  0x54   :  { %1563 = vmatpush.bf16.msrb.mxu1 %v3109_v20  ;;  %v2662_v62 = vld [vmem:[#allocation5 + $0x190] sm:$0xf0]  ;;  %v3705_v63 = vld [vmem:[#allocation5 + $0x284] sm:$0xf]  ;;  %v3065_v1 = vor.u32 %v3773_v55, %v3062_v56 }
  0x55   :  { %v2790_v2 = vld [vmem:[#allocation5 + $0x290] sm:$0xf0]  ;;  %v3737_v3 = vld [vmem:[#allocation5 + $0x384] sm:$0xf]  ;;  %v2665_v7 = vor.u32 %v3673_v61, %v2662_v62 }
  0x56   :  { %1577 = vmatpush.bf16.msrb.mxu2 %v3237_v21  ;;  %1591 = vmatpush.bf16.msrb.mxu3 %v2473_v26  ;;  %v2918_v4 = vld [vmem:[#allocation5 + $0x390] sm:$0xf0]  ;;  %v3769_v5 = vld [vmem:[#allocation5 + $0x484] sm:$0xf]  ;;  %v2793_v8 = vor.u32 %v3705_v63, %v2790_v2 }
  0x57   :  { %1598 = vmatpush.bf16.msra.mxu0 %v2713_v27  ;;  %1564 = vmatmul.bf16.vlgmr.msrb.gmra.mxu1 %v4103_v42  ;;  %v3046_v6 = vld [vmem:[#allocation5 + $0x490] sm:$0xf0]  ;;  %v2921_v9 = vor.u32 %v3737_v3, %v2918_v4  ;;  %v3669_v10 = vld [vmem:[#allocation5 + $0x164] sm:$0xf]  ;;  %v2588_v3 = vld [vmem:[#allocation5 + $0xe8] sm:$0xf] }
  0x58   :  { %1612 = vmatpush.bf16.msra.mxu1 %v2841_v31  ;;  %1550 = vmatmul.bf16.vlgmr.msrb.gmra.mxu0 %v4099_v37  ;;  %v2646_v12 = vld [vmem:[#allocation5 + $0x170] sm:$0xf0]  ;;  %v3701_v13 = vld [vmem:[#allocation5 + $0x264] sm:$0xf]  ;;  %v3049_v14 = vor.u32 %v3769_v5, %v3046_v6  ;;  %v3656_v4 = vld [vmem:[#allocation5 + $0xf4] sm:$0xf0] }
  0x59   :  { %1578 = vmatmul.bf16.vlgmr.msrb.gmra.mxu2 %v4101_v41  ;;  %1592 = vmatmul.bf16.vlgmr.msrb.gmra.mxu3 %v4087_v57  ;;  %v2774_v15 = vld [vmem:[#allocation5 + $0x270] sm:$0xf0]  ;;  %v3733_v16 = vld [vmem:[#allocation5 + $0x364] sm:$0xf]  ;;  %v2649_v20 = vor.u32 %v3669_v10, %v2646_v12 }
  0x5a   :  { %1626 = vmatpush.bf16.msra.mxu2 %v2969_v32  ;;  %1640 = vmatpush.bf16.msra.mxu3 %v3097_v36  ;;  %v2902_v17 = vld [vmem:[#allocation5 + $0x370] sm:$0xf0]  ;;  %v3765_v18 = vld [vmem:[#allocation5 + $0x464] sm:$0xf]  ;;  %v2777_v21 = vor.u32 %v3701_v13, %v2774_v15  ;;  %v2589_v13 = vor.u32 %v3656_v4, %v2588_v3 }
  0x5b   :  { %1599 = vmatpush.bf16.msra.mxu0 %v2697_v45  ;;  %v3030_v19 = vld [vmem:[#allocation5 + $0x470] sm:$0xf0]  ;;  %v2905_v22 = vor.u32 %v3733_v16, %v2902_v17  ;;  %v3665_v24 = vld [vmem:[#allocation5 + $0x144] sm:$0xf] }
  0x5c   :  { %1613 = vmatpush.bf16.msra.mxu1 %v2825_v46  ;;  %v2630_v25 = vld [vmem:[#allocation5 + $0x150] sm:$0xf0]  ;;  %v3697_v26 = vld [vmem:[#allocation5 + $0x244] sm:$0xf]  ;;  %v3033_v27 = vor.u32 %v3765_v18, %v3030_v19  ;;  %v2572_v19 = vld [vmem:[#allocation5 + $0xc8] sm:$0xf] }
  0x5d   :  { %v2758_v28 = vld [vmem:[#allocation5 + $0x250] sm:$0xf0]  ;;  %v3729_v29 = vld [vmem:[#allocation5 + $0x344] sm:$0xf]  ;;  %v2633_v33 = vor.u32 %v3665_v24, %v2630_v25 }
  0x5e   :  { %1627 = vmatpush.bf16.msra.mxu2 %v2953_v47  ;;  %1641 = vmatpush.bf16.msra.mxu3 %v3081_v51  ;;  %v2886_v30 = vld [vmem:[#allocation5 + $0x350] sm:$0xf0]  ;;  %v3761_v31 = vld [vmem:[#allocation5 + $0x444] sm:$0xf]  ;;  %v2761_v34 = vor.u32 %v3697_v26, %v2758_v28 }
  0x5f   :  { %1600 = vmatpush.bf16.msra.mxu0 %v2681_v58  ;;  %v3014_v32 = vld [vmem:[#allocation5 + $0x450] sm:$0xf0]  ;;  %v2889_v35 = vor.u32 %v3729_v29, %v2886_v30  ;;  %v3661_v36 = vld [vmem:[#allocation5 + $0x124] sm:$0xf] }
  0x60   :  { %1614 = vmatpush.bf16.msra.mxu1 %v2809_v59  ;;  %v2614_v38 = vld [vmem:[#allocation5 + $0x130] sm:$0xf0]  ;;  %v3693_v39 = vld [vmem:[#allocation5 + $0x224] sm:$0xf]  ;;  %v3017_v40 = vor.u32 %v3761_v31, %v3014_v32  ;;  %v2556_v32 = vld [vmem:[#allocation5 + $0xa8] sm:$0xf] }
  0x61   :  { %v2742_v43 = vld [vmem:[#allocation5 + $0x230] sm:$0xf0]  ;;  %v3725_v44 = vld [vmem:[#allocation5 + $0x324] sm:$0xf]  ;;  %v2617_v48 = vor.u32 %v3661_v36, %v2614_v38 }
  0x62   :  { %1628 = vmatpush.bf16.msra.mxu2 %v2937_v60  ;;  %1642 = vmatpush.bf16.msra.mxu3 %v3065_v1  ;;  %v2870_v45 = vld [vmem:[#allocation5 + $0x330] sm:$0xf0]  ;;  %v3757_v46 = vld [vmem:[#allocation5 + $0x424] sm:$0xf]  ;;  %v2745_v51 = vor.u32 %v3693_v39, %v2742_v43 }
  0x63   :  { %1601 = vmatpush.bf16.msra.mxu0 %v2665_v7  ;;  %v2998_v47 = vld [vmem:[#allocation5 + $0x430] sm:$0xf0]  ;;  %v3657_v49 = vld [vmem:[#allocation5 + $0x104] sm:$0xf]  ;;  %v2873_v52 = vor.u32 %v3725_v44, %v2870_v45  ;;  %v2716_v7 = vld [vmem:[#allocation5 + $0x1e8] sm:$0xf] }
  0x64   :  { %1615 = vmatpush.bf16.msra.mxu1 %v2793_v8  ;;  %v2598_v50 = vld [vmem:[#allocation5 + $0x110] sm:$0xf0]  ;;  %v3689_v53 = vld [vmem:[#allocation5 + $0x204] sm:$0xf]  ;;  %v3001_v56 = vor.u32 %v3757_v46, %v2998_v47  ;;  %v3688_v8 = vld [vmem:[#allocation5 + $0x1f4] sm:$0xf0] }
  0x65   :  { %v2726_v54 = vld [vmem:[#allocation5 + $0x210] sm:$0xf0]  ;;  %v3721_v55 = vld [vmem:[#allocation5 + $0x304] sm:$0xf]  ;;  %v2601_v1 = vor.u32 %v3657_v49, %v2598_v50  ;;  %v2717_v17 = vor.u32 %v3688_v8, %v2716_v7  ;;  %v2540_v47 = vld [vmem:[#allocation5 + $0x88] sm:$0xf] }
  0x66   :  { %1629 = vmatpush.bf16.msra.mxu2 %v2921_v9  ;;  %1643 = vmatpush.bf16.msra.mxu3 %v3049_v14  ;;  %v2854_v58 = vld [vmem:[#allocation5 + $0x310] sm:$0xf0]  ;;  %v3753_v59 = vld [vmem:[#allocation5 + $0x404] sm:$0xf]  ;;  %v2729_v5 = vor.u32 %v3689_v53, %v2726_v54  ;;  %v2668_v49 = vld [vmem:[#allocation5 + $0x188] sm:$0xf] }
  0x67   :  { %1602 = vmatpush.bf16.msra.mxu0 %v2649_v20  ;;  %v2982_v60 = vld [vmem:[#allocation5 + $0x410] sm:$0xf0]  ;;  %v3813_v61 = vld [vmem:[#allocation5 + $0x5e4] sm:$0xf]  ;;  %v2857_v6 = vor.u32 %v3721_v55, %v2854_v58  ;;  %v3652_v20 = vld [vmem:[#allocation5 + $0xd4] sm:$0xf0] }
  0x68   :  { %1616 = vmatpush.bf16.msra.mxu1 %v2777_v21  ;;  %v3222_v62 = vld [vmem:[#allocation5 + $0x5f0] sm:$0xf0]  ;;  %v3845_v63 = vld [vmem:[#allocation5 + $0x6e4] sm:$0xf]  ;;  %v2985_v9 = vor.u32 %v3753_v59, %v2982_v60  ;;  %v2700_v21 = vld [vmem:[#allocation5 + $0x1c8] sm:$0xf]  ;;  %v2573_v26 = vor.u32 %v3652_v20, %v2572_v19 }
  0x69   :  { %v3350_v2 = vld [vmem:[#allocation5 + $0x6f0] sm:$0xf0]  ;;  %v3225_v10 = vor.u32 %v3813_v61, %v3222_v62  ;;  %v3809_v14 = vld [vmem:[#allocation5 + $0x5c4] sm:$0xf]  ;;  %v3676_v50 = vld [vmem:[#allocation5 + $0x194] sm:$0xf0] }
  0x6a   :  { %1630 = vmatpush.bf16.msra.mxu2 %v2905_v22  ;;  %1644 = vmatpush.bf16.msra.mxu3 %v3033_v27  ;;  %v3353_v12 = vor.u32 %v3845_v63, %v3350_v2  ;;  %v3206_v15 = vld [vmem:[#allocation5 + $0x5d0] sm:$0xf0]  ;;  %v3841_v16 = vld [vmem:[#allocation5 + $0x6c4] sm:$0xf]  ;;  %v3684_v22 = vld [vmem:[#allocation5 + $0x1d4] sm:$0xf0]  ;;  %v2669_v58 = vor.u32 %v3676_v50, %v2668_v49 }
  0x6b   :  { %1603 = vmatpush.bf16.msra.mxu0 %v2633_v33  ;;  %v3334_v18 = vld [vmem:[#allocation5 + $0x6d0] sm:$0xf0]  ;;  %v3209_v24 = vor.u32 %v3809_v14, %v3206_v15  ;;  %v3805_v27 = vld [vmem:[#allocation5 + $0x5a4] sm:$0xf]  ;;  %v2701_v30 = vor.u32 %v3684_v22, %v2700_v21  ;;  %v3648_v33 = vld [vmem:[#allocation5 + $0xb4] sm:$0xf0] }
  0x6c   :  { %1617 = vmatpush.bf16.msra.mxu1 %v2761_v34  ;;  %v3337_v25 = vor.u32 %v3841_v16, %v3334_v18  ;;  %v3190_v28 = vld [vmem:[#allocation5 + $0x5b0] sm:$0xf0]  ;;  %v3837_v29 = vld [vmem:[#allocation5 + $0x6a4] sm:$0xf]  ;;  %v2684_v34 = vld [vmem:[#allocation5 + $0x1a8] sm:$0xf]  ;;  %v2557_v39 = vor.u32 %v3648_v33, %v2556_v32 }
  0x6d   :  { %v3318_v31 = vld [vmem:[#allocation5 + $0x6b0] sm:$0xf0]  ;;  %v3193_v36 = vor.u32 %v3805_v27, %v3190_v28  ;;  %v3833_v44 = vld [vmem:[#allocation5 + $0x684] sm:$0xf]  ;;  %v2524_v60 = vld [vmem:[#allocation5 + $0x68] sm:$0xf] }
  0x6e   :  { %1631 = vmatpush.bf16.msra.mxu2 %v2889_v35  ;;  %1645 = vmatpush.bf16.msra.mxu3 %v3017_v40  ;;  %v3680_v35 = vld [vmem:[#allocation5 + $0x1b4] sm:$0xf0]  ;;  %v3321_v38 = vor.u32 %v3837_v29, %v3318_v31  ;;  %v3801_v40 = vld [vmem:[#allocation5 + $0x584] sm:$0xf]  ;;  %v3174_v43 = vld [vmem:[#allocation5 + $0x590] sm:$0xf0] }
  0x6f   :  { %1604 = vmatpush.bf16.msra.mxu0 %v2617_v48  ;;  %v2685_v45 = vor.u32 %v3680_v35, %v2684_v34  ;;  %v3302_v46 = vld [vmem:[#allocation5 + $0x690] sm:$0xf0]  ;;  %v3644_v48 = vld [vmem:[#allocation5 + $0x94] sm:$0xf0]  ;;  %v3797_v54 = vld [vmem:[#allocation5 + $0x564] sm:$0xf] }
  0x70   :  { %1618 = vmatpush.bf16.msra.mxu1 %v2745_v51  ;;  %v3177_v51 = vor.u32 %v3801_v40, %v3174_v43  ;;  %v2541_v53 = vor.u32 %v3644_v48, %v2540_v47  ;;  %v3158_v55 = vld [vmem:[#allocation5 + $0x570] sm:$0xf0]  ;;  %v3640_v61 = vld [vmem:[#allocation5 + $0x74] sm:$0xf0]  ;;  %v2652_v62 = vld [vmem:[#allocation5 + $0x168] sm:$0xf] }
  0x71   :  { %v3286_v59 = vld [vmem:[#allocation5 + $0x670] sm:$0xf0]  ;;  %v3672_v63 = vld [vmem:[#allocation5 + $0x174] sm:$0xf0]  ;;  %v2525_v3 = vor.u32 %v3640_v61, %v2524_v60  ;;  %v3793_v4 = vld [vmem:[#allocation5 + $0x544] sm:$0xf] }
  0x72   :  { %1632 = vmatpush.bf16.msra.mxu2 %v2873_v52  ;;  %1646 = vmatpush.bf16.msra.mxu3 %v3001_v56  ;;  %v3305_v52 = vor.u32 %v3833_v44, %v3302_v46  ;;  %v3829_v56 = vld [vmem:[#allocation5 + $0x664] sm:$0xf]  ;;  %v2653_v7 = vor.u32 %v3672_v63, %v2652_v62  ;;  %v3270_v8 = vld [vmem:[#allocation5 + $0x650] sm:$0xf0]  ;;  %v2492_v22 = vld [vmem:[#allocation5 + $0x28] sm:$0xf] }
  0x73   :  { %1605 = vmatpush.bf16.msra.mxu0 %v2601_v1  ;;  %v3161_v1 = vor.u32 %v3797_v54, %v3158_v55  ;;  %v3289_v2 = vor.u32 %v3829_v56, %v3286_v59  ;;  %v3126_v18 = vld [vmem:[#allocation5 + $0x530] sm:$0xf0]  ;;  %v3821_v19 = vld [vmem:[#allocation5 + $0x624] sm:$0xf]  ;;  %v2476_v34 = vld [vmem:[#allocation5 + $0x8] sm:$0xf] }
  0x74   :  { %1619 = vmatpush.bf16.msra.mxu1 %v2729_v5  ;;  %v3142_v5 = vld [vmem:[#allocation5 + $0x550] sm:$0xf0]  ;;  %v3785_v28 = vld [vmem:[#allocation5 + $0x504] sm:$0xf]  ;;  %v2844_v40 = vld [vmem:[#allocation5 + $0x2e8] sm:$0xf] }
  0x75   :  { %v3145_v14 = vor.u32 %v3793_v4, %v3142_v5  ;;  %v3254_v21 = vld [vmem:[#allocation5 + $0x630] sm:$0xf0]  ;;  %v3817_v32 = vld [vmem:[#allocation5 + $0x604] sm:$0xf]  ;;  %v3720_v43 = vld [vmem:[#allocation5 + $0x2f4] sm:$0xf0] }
  0x76   :  { %1633 = vmatpush.bf16.msra.mxu2 %v2857_v6  ;;  %1647 = vmatpush.bf16.msra.mxu3 %v2985_v9  ;;  %v3825_v6 = vld [vmem:[#allocation5 + $0x644] sm:$0xf]  ;;  %v2508_v9 = vld [vmem:[#allocation5 + $0x48] sm:$0xf]  ;;  %v3110_v29 = vld [vmem:[#allocation5 + $0x510] sm:$0xf0]  ;;  %v2845_v54 = vor.u32 %v3720_v43, %v2844_v40 }
  0x77   :  { %1654 = vmatpush.bf16.msrb.mxu0 %v3225_v10  ;;  %1620 = vmatmul.bf16.vlgmr.msra.gmra.mxu1 %v4089_v0  ;;  %v3636_v10 = vld [vmem:[#allocation5 + $0x54] sm:$0xf0]  ;;  %v3273_v15 = vor.u32 %v3825_v6, %v3270_v8  ;;  %v3238_v33 = vld [vmem:[#allocation5 + $0x610] sm:$0xf0]  ;;  %v2972_v44 = vld [vmem:[#allocation5 + $0x3e8] sm:$0xf] }
  0x78   :  { %1668 = vmatpush.bf16.msrb.mxu1 %v3353_v12  ;;  %1606 = vmatmul.bf16.vlgmr.msra.gmra.mxu0 %v4093_v11  ;;  %v2636_v12 = vld [vmem:[#allocation5 + $0x148] sm:$0xf]  ;;  %v2509_v16 = vor.u32 %v3636_v10, %v2508_v9  ;;  %v3752_v46 = vld [vmem:[#allocation5 + $0x3f4] sm:$0xf0]  ;;  %v3241_v49 = vor.u32 %v3817_v32, %v3238_v33 }
  0x79   :  { %1634 = vmatmul.bf16.vlgmr.msra.gmra.mxu2 %v4096_v23  ;;  %1648 = vmatmul.bf16.vlgmr.msra.gmra.mxu3 %v4099_v37  ;;  %v3100_v47 = vld [vmem:[#allocation5 + $0x4e8] sm:$0xf]  ;;  %v3784_v48 = vld [vmem:[#allocation5 + $0x4f4] sm:$0xf0]  ;;  %v2973_v55 = vor.u32 %v3752_v46, %v2972_v44 }
  0x7a   :  { %1682 = vmatpush.bf16.msrb.mxu2 %v2589_v13  ;;  %1696 = vmatpush.bf16.msrb.mxu3 %v2717_v17  ;;  %v3668_v13 = vld [vmem:[#allocation5 + $0x154] sm:$0xf0]  ;;  %v3789_v17 = vld [vmem:[#allocation5 + $0x524] sm:$0xf]  ;;  %v3101_v56 = vor.u32 %v3784_v48, %v3100_v47  ;;  %v2956_v60 = vld [vmem:[#allocation5 + $0x3c8] sm:$0xf] }
  0x7b   :  { %1655 = vmatpush.bf16.msrb.mxu0 %v3209_v24  ;;  %v2637_v20 = vor.u32 %v3668_v13, %v2636_v12  ;;  %v3632_v24 = vld [vmem:[#allocation5 + $0x34] sm:$0xf0]  ;;  %v3129_v27 = vor.u32 %v3789_v17, %v3126_v18  ;;  %v3084_v63 = vld [vmem:[#allocation5 + $0x4c8] sm:$0xf] }
  0x7c   :  { %1669 = vmatpush.bf16.msrb.mxu1 %v3337_v25  ;;  %v2620_v25 = vld [vmem:[#allocation5 + $0x128] sm:$0xf]  ;;  %v2493_v31 = vor.u32 %v3632_v24, %v2492_v22  ;;  %v3716_v59 = vld [vmem:[#allocation5 + $0x2d4] sm:$0xf0] }
  0x7d   :  { %v3748_v62 = vld [vmem:[#allocation5 + $0x3d4] sm:$0xf0]  ;;  %v2940_v9 = vld [vmem:[#allocation5 + $0x3a8] sm:$0xf] }
  0x7e   :  { %1683 = vmatpush.bf16.msrb.mxu2 %v2573_v26  ;;  %1697 = vmatpush.bf16.msrb.mxu3 %v2701_v30  ;;  %v3664_v26 = vld [vmem:[#allocation5 + $0x134] sm:$0xf0]  ;;  %v3257_v30 = vor.u32 %v3821_v19, %v3254_v21  ;;  %v2957_v5 = vor.u32 %v3748_v62, %v2956_v60  ;;  %v3068_v13 = vld [vmem:[#allocation5 + $0x4a8] sm:$0xf] }
  0x7f   :  { %1656 = vmatpush.bf16.msrb.mxu0 %v3193_v36  ;;  %v2621_v35 = vor.u32 %v3664_v26, %v2620_v25  ;;  %v3628_v36 = vld [vmem:[#allocation5 + $0x14] sm:$0xf0]  ;;  %v2924_v22 = vld [vmem:[#allocation5 + $0x388] sm:$0xf] }
  0x80   :  { %1670 = vmatpush.bf16.msrb.mxu1 %v3321_v38  ;;  %v2604_v38 = vld [vmem:[#allocation5 + $0x108] sm:$0xf]  ;;  %v2477_v50 = vor.u32 %v3628_v36, %v2476_v34  ;;  %v3712_v8 = vld [vmem:[#allocation5 + $0x2b4] sm:$0xf0] }
  0x81   :  { %v3744_v12 = vld [vmem:[#allocation5 + $0x3b4] sm:$0xf0]  ;;  %v3052_v26 = vld [vmem:[#allocation5 + $0x488] sm:$0xf] }
  0x82   :  { %1684 = vmatpush.bf16.msrb.mxu2 %v2557_v39  ;;  %1698 = vmatpush.bf16.msrb.mxu3 %v2685_v45  ;;  %v3660_v39 = vld [vmem:[#allocation5 + $0x114] sm:$0xf0]  ;;  %v3113_v45 = vor.u32 %v3785_v28, %v3110_v29  ;;  %v2941_v18 = vor.u32 %v3744_v12, %v2940_v9  ;;  %v3180_v28 = vld [vmem:[#allocation5 + $0x588] sm:$0xf] }
  0x83   :  { %1657 = vmatpush.bf16.msrb.mxu0 %v3177_v51  ;;  %v3228_v51 = vld [vmem:[#allocation5 + $0x5e8] sm:$0xf]  ;;  %v3708_v21 = vld [vmem:[#allocation5 + $0x294] sm:$0xf0] }
  0x84   :  { %1671 = vmatpush.bf16.msrb.mxu1 %v3305_v52  ;;  %v3816_v52 = vld [vmem:[#allocation5 + $0x5f4] sm:$0xf0]  ;;  %v2780_v33 = vld [vmem:[#allocation5 + $0x268] sm:$0xf] }
  0x85   :  { %v3229_v61 = vor.u32 %v3816_v52, %v3228_v51  ;;  %v3740_v25 = vld [vmem:[#allocation5 + $0x394] sm:$0xf0]  ;;  %v3164_v43 = vld [vmem:[#allocation5 + $0x568] sm:$0xf] }
  0x86   :  { %1685 = vmatpush.bf16.msrb.mxu2 %v2541_v53  ;;  %1699 = vmatpush.bf16.msrb.mxu3 %v2669_v58  ;;  %v2605_v53 = vor.u32 %v3660_v39, %v2604_v38  ;;  %v2828_v58 = vld [vmem:[#allocation5 + $0x2c8] sm:$0xf]  ;;  %v3804_v29 = vld [vmem:[#allocation5 + $0x594] sm:$0xf0] }
  0x87   :  { %1658 = vmatpush.bf16.msrb.mxu0 %v3161_v1  ;;  %v3780_v1 = vld [vmem:[#allocation5 + $0x4d4] sm:$0xf0]  ;;  %v2829_v4 = vor.u32 %v3716_v59, %v2828_v58  ;;  %v3181_v36 = vor.u32 %v3804_v29, %v3180_v28  ;;  %v3036_v39 = vld [vmem:[#allocation5 + $0x468] sm:$0xf] }
  0x88   :  { %1672 = vmatpush.bf16.msrb.mxu1 %v3289_v2  ;;  %v3212_v2 = vld [vmem:[#allocation5 + $0x5c8] sm:$0xf]  ;;  %v3085_v6 = vor.u32 %v3780_v1, %v3084_v63  ;;  %v3704_v34 = vld [vmem:[#allocation5 + $0x274] sm:$0xf0] }
  0x89   :  { %v3736_v38 = vld [vmem:[#allocation5 + $0x374] sm:$0xf0]  ;;  %v2764_v48 = vld [vmem:[#allocation5 + $0x248] sm:$0xf] }
  0x8a   :  { %1686 = vmatpush.bf16.msrb.mxu2 %v2525_v3  ;;  %1700 = vmatpush.bf16.msrb.mxu3 %v2653_v7  ;;  %v3812_v3 = vld [vmem:[#allocation5 + $0x5d4] sm:$0xf0]  ;;  %v2812_v7 = vld [vmem:[#allocation5 + $0x2a8] sm:$0xf] }
  0x8b   :  { %1659 = vmatpush.bf16.msrb.mxu0 %v3145_v14  ;;  %v3213_v10 = vor.u32 %v3812_v3, %v3212_v2  ;;  %v3776_v14 = vld [vmem:[#allocation5 + $0x4b4] sm:$0xf0]  ;;  %v2813_v17 = vor.u32 %v3712_v8, %v2812_v7  ;;  %v2876_v63 = vld [vmem:[#allocation5 + $0x328] sm:$0xf] }
  0x8c   :  { %1673 = vmatpush.bf16.msrb.mxu1 %v3273_v15  ;;  %v3196_v15 = vld [vmem:[#allocation5 + $0x5a8] sm:$0xf]  ;;  %v3069_v19 = vor.u32 %v3776_v14, %v3068_v13  ;;  %v3768_v40 = vld [vmem:[#allocation5 + $0x474] sm:$0xf0] }
  0x8d   :  { %v3800_v44 = vld [vmem:[#allocation5 + $0x574] sm:$0xf0]  ;;  %v3037_v47 = vor.u32 %v3768_v40, %v3036_v39  ;;  %v3004_v3 = vld [vmem:[#allocation5 + $0x428] sm:$0xf]  ;;  %v3650_v39 = vld [vmem:[#allocation5 + $0xcc] sm:$0xf] }
  0x8e   :  { %1687 = vmatpush.bf16.msrb.mxu2 %v2509_v16  ;;  %1701 = vmatpush.bf16.msrb.mxu3 %v2637_v20  ;;  %v3808_v16 = vld [vmem:[#allocation5 + $0x5b4] sm:$0xf0]  ;;  %v2796_v20 = vld [vmem:[#allocation5 + $0x288] sm:$0xf]  ;;  %v3165_v51 = vor.u32 %v3800_v44, %v3164_v43  ;;  %v2574_v43 = vld [vmem:[#allocation5 + $0xd8] sm:$0xf0] }
  0x8f   :  { %1660 = vmatpush.bf16.msrb.mxu0 %v3129_v27  ;;  %v3197_v24 = vor.u32 %v3808_v16, %v3196_v15  ;;  %v3772_v27 = vld [vmem:[#allocation5 + $0x494] sm:$0xf0]  ;;  %v2732_v8 = vld [vmem:[#allocation5 + $0x208] sm:$0xf]  ;;  %v3682_v44 = vld [vmem:[#allocation5 + $0x1cc] sm:$0xf] }
  0x90   :  { %1674 = vmatpush.bf16.msrb.mxu1 %v3257_v30  ;;  %v2797_v30 = vor.u32 %v3708_v21, %v2796_v20  ;;  %v3053_v32 = vor.u32 %v3772_v27, %v3052_v26  ;;  %v3732_v52 = vld [vmem:[#allocation5 + $0x354] sm:$0xf0]  ;;  %v2860_v13 = vld [vmem:[#allocation5 + $0x308] sm:$0xf]  ;;  %v3686_v26 = vld [vmem:[#allocation5 + $0x1ec] sm:$0xf] }
  0x91   :  { %v3696_v62 = vld [vmem:[#allocation5 + $0x234] sm:$0xf0]  ;;  %v2988_v15 = vld [vmem:[#allocation5 + $0x408] sm:$0xf]  ;;  %v2718_v27 = vld [vmem:[#allocation5 + $0x1f8] sm:$0xf0] }
  0x92   :  { %1688 = vmatpush.bf16.msrb.mxu2 %v2493_v31  ;;  %1702 = vmatpush.bf16.msrb.mxu3 %v2621_v35  ;;  %v2925_v31 = vor.u32 %v3740_v25, %v2924_v22  ;;  %v2908_v35 = vld [vmem:[#allocation5 + $0x368] sm:$0xf]  ;;  %v3728_v2 = vld [vmem:[#allocation5 + $0x334] sm:$0xf0]  ;;  %v3654_v22 = vld [vmem:[#allocation5 + $0xec] sm:$0xf] }
  0x93   :  { %1661 = vmatpush.bf16.msrb.mxu0 %v3113_v45  ;;  %v2781_v45 = vor.u32 %v3704_v34, %v2780_v33  ;;  %v2909_v46 = vor.u32 %v3736_v38, %v2908_v35  ;;  %v3692_v9 = vld [vmem:[#allocation5 + $0x214] sm:$0xf0]  ;;  %v3356_v20 = vld [vmem:[#allocation5 + $0x6e8] sm:$0xf]  ;;  %v2590_v25 = vld [vmem:[#allocation5 + $0xf8] sm:$0xf0]  ;;  %v2721_v35 = vor.u32 %v3686_v26, %v2718_v27 }
  0x94   :  { %1675 = vmatpush.bf16.msrb.mxu1 %v3241_v49  ;;  %v3700_v49 = vld [vmem:[#allocation5 + $0x254] sm:$0xf0]  ;;  %v2593_v34 = vor.u32 %v3654_v22, %v2590_v25  ;;  %v2782_v22 = vld [vmem:[#allocation5 + $0x278] sm:$0xf0]  ;;  %v3276_v27 = vld [vmem:[#allocation5 + $0x648] sm:$0xf] }
  0x95   :  { %v2765_v58 = vor.u32 %v3700_v49, %v2764_v48  ;;  %v3724_v14 = vld [vmem:[#allocation5 + $0x314] sm:$0xf0]  ;;  %v2577_v49 = vor.u32 %v3650_v39, %v2574_v43 }
  0x96   :  { %1689 = vmatpush.bf16.msrb.mxu2 %v2477_v50  ;;  %1703 = vmatpush.bf16.msrb.mxu3 %v2605_v53  ;;  %v2892_v50 = vld [vmem:[#allocation5 + $0x348] sm:$0xf]  ;;  %v3848_v21 = vld [vmem:[#allocation5 + $0x6f4] sm:$0xf0]  ;;  %v2861_v28 = vor.u32 %v3724_v14, %v2860_v13 }
  0x97   :  { %1710 = vmatpush.bf16.msra.mxu0 %v2845_v54  ;;  %1676 = vmatmul.bf16.vlgmr.msrb.gmra.mxu1 %v4101_v41  ;;  %v3020_v53 = vld [vmem:[#allocation5 + $0x448] sm:$0xf]  ;;  %v3764_v54 = vld [vmem:[#allocation5 + $0x454] sm:$0xf0]  ;;  %v2893_v59 = vor.u32 %v3732_v52, %v2892_v50  ;;  %v3357_v33 = vor.u32 %v3848_v21, %v3356_v20  ;;  %v2654_v20 = vld [vmem:[#allocation5 + $0x178] sm:$0xf0] }
  0x98   :  { %1724 = vmatpush.bf16.msra.mxu1 %v2973_v55  ;;  %1662 = vmatmul.bf16.vlgmr.msrb.gmra.mxu0 %v4103_v42  ;;  %v3148_v55 = vld [vmem:[#allocation5 + $0x548] sm:$0xf]  ;;  %v3021_v60 = vor.u32 %v3764_v54, %v3020_v53  ;;  %v3844_v38 = vld [vmem:[#allocation5 + $0x6d4] sm:$0xf0]  ;;  %v3646_v53 = vld [vmem:[#allocation5 + $0xac] sm:$0xf] }
  0x99   :  { %1690 = vmatmul.bf16.vlgmr.msrb.gmra.mxu2 %v4087_v57  ;;  %1704 = vmatmul.bf16.vlgmr.msrb.gmra.mxu3 %v4093_v11  ;;  %v3840_v52 = vld [vmem:[#allocation5 + $0x6b4] sm:$0xf0]  ;;  %v3292_v14 = vld [vmem:[#allocation5 + $0x668] sm:$0xf]  ;;  %v3702_v21 = vld [vmem:[#allocation5 + $0x26c] sm:$0xf] }
  0x9a   :  { %1738 = vmatpush.bf16.msra.mxu2 %v3101_v56  ;;  %1752 = vmatpush.bf16.msra.mxu3 %v3229_v61  ;;  %v3796_v56 = vld [vmem:[#allocation5 + $0x554] sm:$0xf0]  ;;  %v2748_v61 = vld [vmem:[#allocation5 + $0x228] sm:$0xf] }
  0x9b   :  { %1711 = vmatpush.bf16.msra.mxu0 %v2829_v4  ;;  %v3149_v1 = vor.u32 %v3796_v56, %v3148_v55  ;;  %v3760_v4 = vld [vmem:[#allocation5 + $0x434] sm:$0xf0]  ;;  %v2749_v7 = vor.u32 %v3696_v62, %v2748_v61  ;;  %v2558_v55 = vld [vmem:[#allocation5 + $0xb8] sm:$0xf0]  ;;  %v3678_v56 = vld [vmem:[#allocation5 + $0x1ac] sm:$0xf] }
  0x9c   :  { %1725 = vmatpush.bf16.msra.mxu1 %v2957_v5  ;;  %v3132_v5 = vld [vmem:[#allocation5 + $0x528] sm:$0xf]  ;;  %v3005_v12 = vor.u32 %v3760_v4, %v3004_v3  ;;  %v2561_v62 = vor.u32 %v3646_v53, %v2558_v55  ;;  %v3642_v3 = vld [vmem:[#allocation5 + $0x8c] sm:$0xf]  ;;  %v3824_v43 = vld [vmem:[#allocation5 + $0x634] sm:$0xf0] }
  0x9d   :  { %v3820_v53 = vld [vmem:[#allocation5 + $0x614] sm:$0xf0] }
  0x9e   :  { %1739 = vmatpush.bf16.msra.mxu2 %v3085_v6  ;;  %1753 = vmatpush.bf16.msra.mxu3 %v3213_v10  ;;  %v3792_v6 = vld [vmem:[#allocation5 + $0x534] sm:$0xf0]  ;;  %v2877_v10 = vor.u32 %v3728_v2, %v2876_v63 }
  0x9f   :  { %1712 = vmatpush.bf16.msra.mxu0 %v2813_v17  ;;  %v3133_v16 = vor.u32 %v3792_v6, %v3132_v5  ;;  %v3756_v17 = vld [vmem:[#allocation5 + $0x414] sm:$0xf0]  ;;  %v2542_v5 = vld [vmem:[#allocation5 + $0x98] sm:$0xf0]  ;;  %v3674_v6 = vld [vmem:[#allocation5 + $0x18c] sm:$0xf] }
  0xa0   :  { %1726 = vmatpush.bf16.msra.mxu1 %v2941_v18  ;;  %v3116_v18 = vld [vmem:[#allocation5 + $0x508] sm:$0xf]  ;;  %v2989_v29 = vor.u32 %v3756_v17, %v2988_v15  ;;  %v3836_v2 = vld [vmem:[#allocation5 + $0x694] sm:$0xf0] }
  0xa1   :  { %v3832_v15 = vld [vmem:[#allocation5 + $0x674] sm:$0xf0] }
  0xa2   :  { %1740 = vmatpush.bf16.msra.mxu2 %v3069_v19  ;;  %1754 = vmatpush.bf16.msra.mxu3 %v3197_v24  ;;  %v3788_v19 = vld [vmem:[#allocation5 + $0x514] sm:$0xf0]  ;;  %v2733_v24 = vor.u32 %v3692_v9, %v2732_v8  ;;  %v3706_v8 = vld [vmem:[#allocation5 + $0x28c] sm:$0xf]  ;;  %v2798_v9 = vld [vmem:[#allocation5 + $0x298] sm:$0xf0] }
  0xa3   :  { %1713 = vmatpush.bf16.msra.mxu0 %v2797_v30  ;;  %v3718_v30 = vld [vmem:[#allocation5 + $0x2ec] sm:$0xf]  ;;  %v2801_v17 = vor.u32 %v3706_v8, %v2798_v9 }
  0xa4   :  { %1727 = vmatpush.bf16.msra.mxu1 %v2925_v31  ;;  %v2846_v31 = vld [vmem:[#allocation5 + $0x2f8] sm:$0xf0] }
  0xa5   :  { %v2849_v40 = vor.u32 %v3718_v30, %v2846_v31  ;;  %v2785_v30 = vor.u32 %v3702_v21, %v2782_v22  ;;  %v2510_v31 = vld [vmem:[#allocation5 + $0x58] sm:$0xf0]  ;;  %v3810_v22 = vld [vmem:[#allocation5 + $0x5cc] sm:$0xf] }
  0xa6   :  { %1741 = vmatpush.bf16.msra.mxu2 %v3053_v32  ;;  %1755 = vmatpush.bf16.msra.mxu3 %v3181_v36  ;;  %v3117_v32 = vor.u32 %v3788_v19, %v3116_v18  ;;  %v3340_v36 = vld [vmem:[#allocation5 + $0x6c8] sm:$0xf]  ;;  %v2526_v18 = vld [vmem:[#allocation5 + $0x78] sm:$0xf0]  ;;  %v3670_v19 = vld [vmem:[#allocation5 + $0x16c] sm:$0xf] }
  0xa7   :  { %1714 = vmatpush.bf16.msra.mxu0 %v2781_v45  ;;  %v2702_v45 = vld [vmem:[#allocation5 + $0x1d8] sm:$0xf0]  ;;  %v3341_v48 = vor.u32 %v3844_v38, %v3340_v36  ;;  %v2657_v26 = vor.u32 %v3670_v19, %v2654_v20  ;;  %v3778_v19 = vld [vmem:[#allocation5 + $0x4cc] sm:$0xf] }
  0xa8   :  { %1728 = vmatpush.bf16.msra.mxu1 %v2909_v46  ;;  %v3714_v46 = vld [vmem:[#allocation5 + $0x2cc] sm:$0xf]  ;;  %v2705_v50 = vor.u32 %v3682_v44, %v2702_v45  ;;  %v3086_v21 = vld [vmem:[#allocation5 + $0x4d8] sm:$0xf0] }
  0xa9   :  { %v3630_v44 = vld [vmem:[#allocation5 + $0x2c] sm:$0xf] }
  0xaa   :  { %1742 = vmatpush.bf16.msra.mxu2 %v3037_v47  ;;  %1756 = vmatpush.bf16.msra.mxu3 %v3165_v51  ;;  %v2830_v47 = vld [vmem:[#allocation5 + $0x2d8] sm:$0xf0]  ;;  %v3324_v51 = vld [vmem:[#allocation5 + $0x6a8] sm:$0xf] }
  0xab   :  { %1715 = vmatpush.bf16.msra.mxu0 %v2765_v58  ;;  %v2833_v54 = vor.u32 %v3714_v46, %v2830_v47  ;;  %v2686_v58 = vld [vmem:[#allocation5 + $0x1b8] sm:$0xf0]  ;;  %v3325_v61 = vor.u32 %v3840_v52, %v3324_v51  ;;  %v3662_v47 = vld [vmem:[#allocation5 + $0x12c] sm:$0xf]  ;;  %v3244_v52 = vld [vmem:[#allocation5 + $0x608] sm:$0xf] }
  0xac   :  { %1729 = vmatpush.bf16.msra.mxu1 %v2893_v59  ;;  %v3710_v59 = vld [vmem:[#allocation5 + $0x2ac] sm:$0xf]  ;;  %v2689_v63 = vor.u32 %v3678_v56, %v2686_v58  ;;  %v2494_v46 = vld [vmem:[#allocation5 + $0x38] sm:$0xf0] }
  0xad   :  { %v3626_v56 = vld [vmem:[#allocation5 + $0xc] sm:$0xf]  ;;  %v2478_v58 = vld [vmem:[#allocation5 + $0x18] sm:$0xf0] }
  0xae   :  { %1743 = vmatpush.bf16.msra.mxu2 %v3021_v60  ;;  %1757 = vmatpush.bf16.msra.mxu3 %v3149_v1  ;;  %v2814_v60 = vld [vmem:[#allocation5 + $0x2b8] sm:$0xf0]  ;;  %v3308_v1 = vld [vmem:[#allocation5 + $0x688] sm:$0xf]  ;;  %v2481_v8 = vor.u32 %v3626_v56, %v2478_v58  ;;  %v3766_v58 = vld [vmem:[#allocation5 + $0x46c] sm:$0xf] }
  0xaf   :  { %1716 = vmatpush.bf16.msra.mxu0 %v2749_v7  ;;  %v2817_v4 = vor.u32 %v3710_v59, %v2814_v60  ;;  %v2670_v7 = vld [vmem:[#allocation5 + $0x198] sm:$0xf0]  ;;  %v3658_v59 = vld [vmem:[#allocation5 + $0x10c] sm:$0xf] }
  0xb0   :  { %1730 = vmatpush.bf16.msra.mxu1 %v2877_v10  ;;  %v3309_v10 = vor.u32 %v3836_v2, %v3308_v1  ;;  %v2673_v13 = vor.u32 %v3674_v6, %v2670_v7  ;;  %v3750_v1 = vld [vmem:[#allocation5 + $0x3ec] sm:$0xf]  ;;  %v2974_v2 = vld [vmem:[#allocation5 + $0x3f8] sm:$0xf0] }
  0xb1   :  { %v3814_v6 = vld [vmem:[#allocation5 + $0x5ec] sm:$0xf]  ;;  %v3230_v7 = vld [vmem:[#allocation5 + $0x5f8] sm:$0xf0] }
  0xb2   :  { %1744 = vmatpush.bf16.msra.mxu2 %v3005_v12  ;;  %1758 = vmatpush.bf16.msra.mxu3 %v3133_v16  ;;  %v2545_v12 = vor.u32 %v3642_v3, %v2542_v5  ;;  %v3638_v16 = vld [vmem:[#allocation5 + $0x6c] sm:$0xf]  ;;  %v3102_v5 = vld [vmem:[#allocation5 + $0x4f8] sm:$0xf0] }
  0xb3   :  { %1717 = vmatpush.bf16.msra.mxu0 %v2733_v24  ;;  %v3293_v24 = vor.u32 %v3832_v15, %v3292_v14  ;;  %v2529_v25 = vor.u32 %v3638_v16, %v2526_v18  ;;  %v3782_v3 = vld [vmem:[#allocation5 + $0x4ec] sm:$0xf]  ;;  %v2977_v14 = vor.u32 %v3750_v1, %v2974_v2  ;;  %v3233_v16 = vor.u32 %v3814_v6, %v3230_v7  ;;  %v2958_v18 = vld [vmem:[#allocation5 + $0x3d8] sm:$0xf0] }
  0xb4   :  { %1731 = vmatpush.bf16.msra.mxu1 %v2861_v28  ;;  %v3828_v28 = vld [vmem:[#allocation5 + $0x654] sm:$0xf0]  ;;  %v3105_v15 = vor.u32 %v3782_v3, %v3102_v5  ;;  %v2910_v56 = vld [vmem:[#allocation5 + $0x378] sm:$0xf0]  ;;  %v4127_v2 = vpop.f32.mrf.mxu1  ;;  %v3730_v6 = vld [vmem:[#allocation5 + $0x34c] sm:$0xf] }
  0xb5   :  { %v3277_v36 = vor.u32 %v3828_v28, %v3276_v27  ;;  %v3089_v28 = vor.u32 %v3778_v19, %v3086_v21  ;;  %v3294_v1 = vld [vmem:[#allocation5 + $0x678] sm:$0xf0]  ;;  %v3726_v21 = vld [vmem:[#allocation5 + $0x32c] sm:$0xf] }
  0xb6   :  { %1745 = vmatpush.bf16.msra.mxu2 %v2989_v29  ;;  %1759 = vmatpush.bf16.msra.mxu3 %v3117_v32  ;;  %v3634_v29 = vld [vmem:[#allocation5 + $0x4c] sm:$0xf]  ;;  %v2894_v7 = vld [vmem:[#allocation5 + $0x358] sm:$0xf0] }
  0xb7   :  { %1766 = vmatpush.bf16.msrb.mxu0 %v3357_v33  ;;  %1732 = vmatmul.bf16.vlgmr.msra.gmra.mxu1 %v4096_v23  ;;  %v3666_v32 = vld [vmem:[#allocation5 + $0x14c] sm:$0xf]  ;;  %v2638_v33 = vld [vmem:[#allocation5 + $0x158] sm:$0xf0]  ;;  %v2513_v38 = vor.u32 %v3634_v29, %v2510_v31 }
  0xb8   :  { %1780 = vmatpush.bf16.msrb.mxu1 %v2593_v34  ;;  %1718 = vmatmul.bf16.vlgmr.msra.gmra.mxu0 %v4089_v0  ;;  %v3698_v34 = vld [vmem:[#allocation5 + $0x24c] sm:$0xf]  ;;  %v2641_v39 = vor.u32 %v3666_v32, %v2638_v33  ;;  %v2942_v31 = vld [vmem:[#allocation5 + $0x3b8] sm:$0xf0] }
  0xb9   :  { %1746 = vmatmul.bf16.vlgmr.msra.gmra.mxu2 %v4099_v37  ;;  %1760 = vmatmul.bf16.vlgmr.msra.gmra.mxu3 %v4103_v42  ;;  %v3774_v32 = vld [vmem:[#allocation5 + $0x4ac] sm:$0xf] }
  0xba   :  { %1794 = vmatpush.bf16.msrb.mxu2 %v2721_v35  ;;  %1808 = vmatpush.bf16.msrb.mxu3 %v2849_v40  ;;  %v2766_v35 = vld [vmem:[#allocation5 + $0x258] sm:$0xf0]  ;;  %v3260_v40 = vld [vmem:[#allocation5 + $0x628] sm:$0xf] }
  0xbb   :  { %1767 = vmatpush.bf16.msrb.mxu0 %v3341_v48  ;;  %v2769_v45 = vor.u32 %v3698_v34, %v2766_v35  ;;  %v2622_v48 = vld [vmem:[#allocation5 + $0x138] sm:$0xf0]  ;;  %v3261_v51 = vor.u32 %v3824_v43, %v3260_v40  ;;  %v3806_v35 = vld [vmem:[#allocation5 + $0x5ac] sm:$0xf] }
  0xbc   :  { %1781 = vmatpush.bf16.msrb.mxu1 %v2577_v49  ;;  %v3694_v49 = vld [vmem:[#allocation5 + $0x22c] sm:$0xf]  ;;  %v2625_v55 = vor.u32 %v3662_v47, %v2622_v48  ;;  %v3070_v34 = vld [vmem:[#allocation5 + $0x4b8] sm:$0xf0] }
  0xbd   :  { %v3073_v43 = vor.u32 %v3774_v32, %v3070_v34  ;;  %v3770_v47 = vld [vmem:[#allocation5 + $0x48c] sm:$0xf] }
  0xbe   :  { %1795 = vmatpush.bf16.msrb.mxu2 %v2705_v50  ;;  %1809 = vmatpush.bf16.msrb.mxu3 %v2833_v54  ;;  %v2750_v50 = vld [vmem:[#allocation5 + $0x238] sm:$0xf0]  ;;  %v2497_v54 = vor.u32 %v3630_v44, %v2494_v46  ;;  %v3722_v34 = vld [vmem:[#allocation5 + $0x30c] sm:$0xf] }
  0xbf   :  { %1768 = vmatpush.bf16.msrb.mxu0 %v3325_v61  ;;  %v2753_v60 = vor.u32 %v3694_v49, %v2750_v50  ;;  %v2606_v61 = vld [vmem:[#allocation5 + $0x118] sm:$0xf0]  ;;  %v3802_v50 = vld [vmem:[#allocation5 + $0x58c] sm:$0xf] }
  0xc0   :  { %1782 = vmatpush.bf16.msrb.mxu1 %v2561_v62  ;;  %v3690_v62 = vld [vmem:[#allocation5 + $0x20c] sm:$0xf]  ;;  %v2609_v9 = vor.u32 %v3658_v59, %v2606_v61  ;;  %v2926_v46 = vld [vmem:[#allocation5 + $0x398] sm:$0xf0] }
  0xc1   :  { %v3054_v49 = vld [vmem:[#allocation5 + $0x498] sm:$0xf0]  ;;  %v3798_v61 = vld [vmem:[#allocation5 + $0x56c] sm:$0xf] }
  0xc2   :  { %1796 = vmatpush.bf16.msrb.mxu2 %v2689_v63  ;;  %1810 = vmatpush.bf16.msrb.mxu3 %v2817_v4  ;;  %v2734_v63 = vld [vmem:[#allocation5 + $0x218] sm:$0xf0]  ;;  %v3245_v4 = vor.u32 %v3820_v53, %v3244_v52  ;;  %v4125_v53 = vpop.f32.mrf.mxu0 }
  0xc3   :  { %1769 = vmatpush.bf16.msrb.mxu0 %v3309_v10  ;;  %v3846_v10 = vld [vmem:[#allocation5 + $0x6ec] sm:$0xf]  ;;  %v3310_v52 = vld [vmem:[#allocation5 + $0x698] sm:$0xf0] }
  0xc4   :  { %1783 = vmatpush.bf16.msrb.mxu1 %v2545_v12  ;;  %v3358_v12 = vld [vmem:[#allocation5 + $0x6f8] sm:$0xf0] }
  0xc5   :  { %v3361_v20 = vor.u32 %v3846_v10, %v3358_v12  ;;  %v3022_v12 = vld [vmem:[#allocation5 + $0x458] sm:$0xf0] }
  0xc6   :  { %1797 = vmatpush.bf16.msrb.mxu2 %v2673_v13  ;;  %1811 = vmatpush.bf16.msrb.mxu3 %v2801_v17  ;;  %v2737_v13 = vor.u32 %v3690_v62, %v2734_v63  ;;  %v3746_v17 = vld [vmem:[#allocation5 + $0x3cc] sm:$0xf]  ;;  %v3166_v62 = vld [vmem:[#allocation5 + $0x578] sm:$0xf0] }
  0xc7   :  { %1770 = vmatpush.bf16.msrb.mxu0 %v3293_v24  ;;  %v3214_v24 = vld [vmem:[#allocation5 + $0x5d8] sm:$0xf0]  ;;  %v2961_v27 = vor.u32 %v3746_v17, %v2958_v18  ;;  %v3830_v63 = vld [vmem:[#allocation5 + $0x66c] sm:$0xf]  ;;  %v3169_v5 = vor.u32 %v3798_v61, %v3166_v62  ;;  %v4131_v17 = vld [vmem:[#allocation7] sm:$0xf]  ;;  %v2897_v18 = vor.u32 %v3730_v6, %v2894_v7 }
  0xc8   :  { %1784 = vmatpush.bf16.msrb.mxu1 %v2529_v25  ;;  %v3842_v25 = vld [vmem:[#allocation5 + $0x6cc] sm:$0xf]  ;;  %v3217_v29 = vor.u32 %v3810_v22, %v3214_v24  ;;  %v3297_v10 = vor.u32 %v3830_v63, %v3294_v1  ;;  %v2878_v22 = vld [vmem:[#allocation5 + $0x338] sm:$0xf0]  ;;  %v322_v32 = vperm.slane %v4131_v17, 0 }
  0xc9   :  { %v3758_v24 = vld [vmem:[#allocation5 + $0x42c] sm:$0xf]  ;;  %v3412_v61 = vld [vmem:[#allocation8 + $0x60] sm:$0xf]  ;;  %v3404_v7 = vld [vmem:[#allocation8 + $0x50] sm:$0xf] }
  0xca   :  { %1798 = vmatpush.bf16.msrb.mxu2 %v2657_v26  ;;  %1812 = vmatpush.bf16.msrb.mxu3 %v2785_v30  ;;  %v3342_v26 = vld [vmem:[#allocation5 + $0x6d8] sm:$0xf0]  ;;  %v3742_v30 = vld [vmem:[#allocation5 + $0x3ac] sm:$0xf] }
  0xcb   :  { %1771 = vmatpush.bf16.msrb.mxu0 %v3277_v36  ;;  %v3345_v33 = vor.u32 %v3842_v25, %v3342_v26  ;;  %v3198_v36 = vld [vmem:[#allocation5 + $0x5b8] sm:$0xf0]  ;;  %v2945_v40 = vor.u32 %v3742_v30, %v2942_v31  ;;  %v1497_v25 = vpop.f32.mrf.mxu0  ;;  %v3822_v30 = vld [vmem:[#allocation5 + $0x62c] sm:$0xf] }
  0xcc   :  { %1785 = vmatpush.bf16.msrb.mxu1 %v2513_v38  ;;  %v3838_v38 = vld [vmem:[#allocation5 + $0x6ac] sm:$0xf]  ;;  %v3201_v44 = vor.u32 %v3806_v35, %v3198_v36  ;;  %v3262_v31 = vld [vmem:[#allocation5 + $0x638] sm:$0xf0] }
  0xcd   :  { %v3862_v62 = vld [vmem:[#allocation8 + $0x64] sm:$0xf0] }
  0xce   :  { %1799 = vmatpush.bf16.msrb.mxu2 %v2641_v39  ;;  %1813 = vmatpush.bf16.msrb.mxu3 %v2769_v45  ;;  %v3326_v39 = vld [vmem:[#allocation5 + $0x6b8] sm:$0xf0]  ;;  %v3738_v45 = vld [vmem:[#allocation5 + $0x38c] sm:$0xf]  ;;  %v3413_v6 = vor.u32 %v3862_v62, %v3412_v61  ;;  %v3863_v61 = vld [vmem:[#allocation8 + $0x74] sm:$0xf] }
  0xcf   :  { %1772 = vmatpush.bf16.msrb.mxu0 %v3261_v51  ;;  %v3329_v48 = vor.u32 %v3838_v38, %v3326_v39  ;;  %v3834_v51 = vld [vmem:[#allocation5 + $0x68c] sm:$0xf]  ;;  %v2862_v38 = vld [vmem:[#allocation5 + $0x318] sm:$0xf0] }
  0xd0   :  { %1786 = vmatpush.bf16.msrb.mxu1 %v2497_v54  ;;  %v3313_v59 = vor.u32 %v3834_v51, %v3310_v52  ;;  %v3754_v39 = vld [vmem:[#allocation5 + $0x40c] sm:$0xf]  ;;  %v1496_v51 = vadd.f32 %v4125_v53, %v322_v32 }
  0xd1   :  { %v3878_v53 = vld [vmem:[#allocation8 + $0xe4] sm:$0xf0] }
  0xd2   :  { %1800 = vmatpush.bf16.msrb.mxu2 %v2625_v55  ;;  %1814 = vmatpush.bf16.msrb.mxu3 %v2753_v60  ;;  %v3734_v55 = vld [vmem:[#allocation5 + $0x36c] sm:$0xf]  ;;  %v3038_v60 = vld [vmem:[#allocation5 + $0x478] sm:$0xf0] }
  0xd3   :  { %1773 = vmatpush.bf16.msrb.mxu0 %v3245_v4  ;;  %v2913_v3 = vor.u32 %v3734_v55, %v2910_v56  ;;  %v3041_v4 = vor.u32 %v3766_v58, %v3038_v60  ;;  %v1498_v55 = vadd.f32 %v1497_v25, %v322_v32 }
  0xd4   :  { %1787 = vmatpush.bf16.msrb.mxu1 %v2481_v8  ;;  %v3762_v8 = vld [vmem:[#allocation5 + $0x44c] sm:$0xf] }
  0xd5   :  { %v3025_v19 = vor.u32 %v3762_v8, %v3022_v12  ;;  %v1551_v1 = vpop.f32.mrf.mxu0  ;;  %v3860_v8 = vld [vmem:[#allocation8 + $0x54] sm:$0xf0] }
  0xd6   :  { %1801 = vmatpush.bf16.msrb.mxu2 %v2609_v9  ;;  %1815 = vmatpush.bf16.msrb.mxu3 %v2737_v13  ;;  %v4129_v9 = vpop.f32.mrf.mxu2  ;;  %v3794_v13 = vld [vmem:[#allocation5 + $0x54c] sm:$0xf] }
  0xd7   :  { %1822 = vmatpush.bf16.msra.mxu0 %v2977_v14  ;;  %1788 = vmatmul.bf16.vlgmr.msrb.gmra.mxu1 %v4087_v57  ;;  %v3057_v57 = vor.u32 %v3770_v47, %v3054_v49  ;;  %v3150_v14 = vld [vmem:[#allocation5 + $0x558] sm:$0xf0]  ;;  %v3818_v47 = vld [vmem:[#allocation5 + $0x60c] sm:$0xf] }
  0xd8   :  { %1836 = vmatpush.bf16.msra.mxu1 %v3105_v15  ;;  %1774 = vmatmul.bf16.vlgmr.msrb.gmra.mxu0 %v4101_v41  ;;  %v3826_v15 = vld [vmem:[#allocation5 + $0x64c] sm:$0xf]  ;;  %v3246_v49 = vld [vmem:[#allocation5 + $0x618] sm:$0xf0] }
  0xd9   :  { %1802 = vmatmul.bf16.vlgmr.msrb.gmra.mxu2 %v4093_v11  ;;  %1816 = vmatmul.bf16.vlgmr.msrb.gmra.mxu3 %v4089_v0  ;;  %v3182_v11 = vld [vmem:[#allocation5 + $0x598] sm:$0xf0]  ;;  %v2929_v0 = vor.u32 %v3738_v45, %v2926_v46  ;;  %v3786_v45 = vld [vmem:[#allocation5 + $0x50c] sm:$0xf] }
  0xda   :  { %1850 = vmatpush.bf16.msra.mxu2 %v3233_v16  ;;  %1864 = vmatpush.bf16.msra.mxu3 %v3361_v20  ;;  %v3185_v54 = vor.u32 %v3802_v50, %v3182_v11  ;;  %v3278_v16 = vld [vmem:[#allocation5 + $0x658] sm:$0xf0]  ;;  %v3153_v20 = vor.u32 %v3794_v13, %v3150_v14  ;;  %v3420_v50 = vld [vmem:[#allocation8 + $0x70] sm:$0xf] }
  0xdb   :  { %1823 = vmatpush.bf16.msra.mxu0 %v2961_v27  ;;  %v3281_v26 = vor.u32 %v3826_v15, %v3278_v16  ;;  %v3006_v27 = vld [vmem:[#allocation5 + $0x438] sm:$0xf0]  ;;  %v3468_v13 = vld [vmem:[#allocation8 + $0xd0] sm:$0xf] }
  0xdc   :  { %1837 = vmatpush.bf16.msra.mxu1 %v3089_v28  ;;  %v3790_v28 = vld [vmem:[#allocation5 + $0x52c] sm:$0xf]  ;;  %v3009_v35 = vor.u32 %v3758_v24, %v3006_v27  ;;  %v3118_v46 = vld [vmem:[#allocation5 + $0x518] sm:$0xf0]  ;;  %v3388_v27 = vld [vmem:[#allocation8 + $0x30] sm:$0xf] }
  0xdd   :  { %v3864_v11 = vld [vmem:[#allocation8 + $0x74] sm:$0xf0]  ;;  %v3121_v58 = vor.u32 %v3786_v45, %v3118_v46  ;;  %v3874_v24 = vld [vmem:[#allocation8 + $0xc4] sm:$0xf0] }
  0xde   :  { %1851 = vmatpush.bf16.msra.mxu2 %v3217_v29  ;;  %1865 = vmatpush.bf16.msra.mxu3 %v3345_v33  ;;  %v3134_v29 = vld [vmem:[#allocation5 + $0x538] sm:$0xf0]  ;;  %v2881_v33 = vor.u32 %v3726_v21, %v2878_v22  ;;  %v1525_v52 = vpop.f32.mrf.mxu2  ;;  %v3421_v60 = vor.u32 %v3864_v11, %v3420_v50  ;;  %v3460_v22 = vld [vmem:[#allocation8 + $0xc0] sm:$0xf]  ;;  %v323_v11 = vperm.slane %v4131_v17, 1 }
  0xdf   :  { %1824 = vmatpush.bf16.msra.mxu0 %v2945_v40  ;;  %v3137_v36 = vor.u32 %v3790_v28, %v3134_v29  ;;  %v2990_v40 = vld [vmem:[#allocation5 + $0x418] sm:$0xf0]  ;;  %v3461_v28 = vor.u32 %v3874_v24, %v3460_v22  ;;  %v3452_v29 = vld [vmem:[#allocation8 + $0xb0] sm:$0xf] }
  0xe0   :  { %1838 = vmatpush.bf16.msra.mxu1 %v3073_v43  ;;  %v1511_v43 = vpop.f32.mrf.mxu1  ;;  %v2993_v56 = vor.u32 %v3754_v39, %v2990_v40  ;;  %v3876_v14 = vld [vmem:[#allocation8 + $0xd4] sm:$0xf0]  ;;  %v3444_v40 = vld [vmem:[#allocation8 + $0xa0] sm:$0xf] }
  0xe1   :  { %v3469_v21 = vor.u32 %v3876_v14, %v3468_v13  ;;  %v3861_v14 = vld [vmem:[#allocation8 + $0x64] sm:$0xf] }
  0xe2   :  { %1852 = vmatpush.bf16.msra.mxu2 %v3201_v44  ;;  %1866 = vmatpush.bf16.msra.mxu3 %v3329_v48  ;;  %v3265_v44 = vor.u32 %v3822_v30, %v3262_v31  ;;  %v1537_v48 = vpop.f32.mrf.mxu3 }
  0xe3   :  { %1825 = vmatpush.bf16.msra.mxu0 %v2929_v0  ;;  %v2865_v0 = vor.u32 %v3722_v34, %v2862_v38 }
  0xe4   :  { %1839 = vmatpush.bf16.msra.mxu1 %v3057_v57  ;;  %v3484_v57 = vld [vmem:[#allocation8 + $0xf0] sm:$0xf] }
  0xe6   :  { %1853 = vmatpush.bf16.msra.mxu2 %v3185_v54  ;;  %1867 = vmatpush.bf16.msra.mxu3 %v3313_v59  ;;  %v3880_v54 = vld [vmem:[#allocation8 + $0xf4] sm:$0xf0]  ;;  %v3249_v59 = vor.u32 %v3818_v47, %v3246_v49 }
  0xe7   :  { %1826 = vmatpush.bf16.msra.mxu0 %v2913_v3  ;;  %v3485_v63 = vor.u32 %v3880_v54, %v3484_v57  ;;  %v3476_v3 = vld [vmem:[#allocation8 + $0xe0] sm:$0xf]  ;;  %v3852_v49 = vld [vmem:[#allocation8 + $0x14] sm:$0xf0] }
  0xe8   :  { %1840 = vmatpush.bf16.msra.mxu1 %v3041_v4  ;;  %v1510_v4 = vadd.f32 %v4127_v2, %v1496_v51  ;;  %v1565_v12 = vpop.f32.mrf.mxu1  ;;  %v3436_v51 = vld [vmem:[#allocation8 + $0x90] sm:$0xf] }
  0xea   :  { %1854 = vmatpush.bf16.msra.mxu2 %v3169_v5  ;;  %1868 = vmatpush.bf16.msra.mxu3 %v3297_v10  ;;  %v1512_v5 = vadd.f32 %v1511_v43, %v1498_v55  ;;  %v3477_v10 = vor.u32 %v3878_v53, %v3476_v3  ;;  %v1524_v2 = vadd.f32 %v4129_v9, %v1510_v4  ;;  %v1539_v16 = vpop.f32.mrf.mxu3  ;;  %v3856_v9 = vld [vmem:[#allocation8 + $0x34] sm:$0xf0]  ;;  %v3870_v43 = vld [vmem:[#allocation8 + $0xa4] sm:$0xf0]  ;;  %v3428_v3 = vld [vmem:[#allocation8 + $0x80] sm:$0xf] }
  0xeb   :  { %1827 = vmatpush.bf16.msra.mxu0 %v2897_v18  ;;  %v1579_v18 = vpop.f32.mrf.mxu2  ;;  %v3389_v34 = vor.u32 %v3856_v9, %v3388_v27  ;;  %v3445_v50 = vor.u32 %v3870_v43, %v3444_v40  ;;  %v3866_v53 = vld [vmem:[#allocation8 + $0x84] sm:$0xf0]  ;;  %v3548_v43 = vld [vmem:[#allocation8 + $0x170] sm:$0xf] }
  0xec   :  { %1841 = vmatpush.bf16.msra.mxu1 %v3025_v19  ;;  %v1526_v15 = vadd.f32 %v1525_v52, %v1512_v5  ;;  %v3396_v19 = vld [vmem:[#allocation8 + $0x40] sm:$0xf]  ;;  %v3868_v52 = vld [vmem:[#allocation8 + $0x94] sm:$0xf0]  ;;  %v3879_v5 = vld [vmem:[#allocation8 + $0xf4] sm:$0xf] }
  0xed   :  { %v3437_v62 = vor.u32 %v3868_v52, %v3436_v51  ;;  %v3871_v51 = vld [vmem:[#allocation8 + $0xb4] sm:$0xf]  ;;  %v3454_v52 = vld [vmem:[#allocation8 + $0xb8] sm:$0xf0] }
  0xee   :  { %1855 = vmatpush.bf16.msra.mxu2 %v3153_v20  ;;  %1869 = vmatpush.bf16.msra.mxu3 %v3281_v26  ;;  %v3858_v20 = vld [vmem:[#allocation8 + $0x44] sm:$0xf0]  ;;  %v1540_v25 = vadd.f32 %v1539_v16, %v1526_v15 }
  0xef   :  { %1828 = vmatpush.bf16.msra.mxu0 %v2881_v33  ;;  %v3397_v26 = vor.u32 %v3858_v20, %v3396_v19  ;;  %v3478_v19 = vld [vmem:[#allocation8 + $0xe8] sm:$0xf0] }
  0xf0   :  { %1842 = vmatpush.bf16.msra.mxu1 %v3009_v35  ;;  %v1567_v33 = vpop.f32.mrf.mxu1  ;;  %v3380_v35 = vld [vmem:[#allocation8 + $0x20] sm:$0xf] }
  0xf2   :  { %1856 = vmatpush.bf16.msra.mxu2 %v3137_v36  ;;  %1870 = vmatpush.bf16.msra.mxu3 %v3265_v44  ;;  %v1593_v32 = vpop.f32.mrf.mxu3  ;;  %v3854_v36 = vld [vmem:[#allocation8 + $0x24] sm:$0xf0] }
  0xf3   :  { %1829 = vmatpush.bf16.msra.mxu0 %v2865_v0  ;;  %v1581_v39 = vpop.f32.mrf.mxu2  ;;  %v3381_v46 = vor.u32 %v3854_v36, %v3380_v35  ;;  %v3873_v35 = vld [vmem:[#allocation8 + $0xc4] sm:$0xf]  ;;  %v3462_v36 = vld [vmem:[#allocation8 + $0xc8] sm:$0xf0] }
  0xf4   :  { %1843 = vmatpush.bf16.msra.mxu1 %v2993_v56  ;;  %v3364_v56 = vld [vmem:[#allocation8] sm:$0xf] }
  0xf6   :  { %1857 = vmatpush.bf16.msra.mxu2 %v3121_v58  ;;  %1871 = vmatpush.bf16.msra.mxu3 %v3249_v59 }
  0xf7   :  { %2288 = vmatpush.bf16.msrb.mxu0 %v3421_v60  ;;  %1844 = vmatmul.bf16.vlgmr.msra.gmra.mxu1 %v4099_v37  ;;  %v1538_v37 = vadd.f32 %v1537_v48, %v1524_v2  ;;  %v3372_v48 = vld [vmem:[#allocation8 + $0x10] sm:$0xf]  ;;  %v3850_v60 = vld [vmem:[#allocation8 + $0x4] sm:$0xf0]  ;;  %v3414_v2 = vld [vmem:[#allocation8 + $0x68] sm:$0xf0] }
  0xf8   :  { %1830 = vmatmul.bf16.vlgmr.msra.gmra.mxu0 %v4096_v23  ;;  %2302 = vmatpush.bf16.msrb.mxu1 %v3485_v63  ;;  %v3405_v23 = vor.u32 %v3860_v8, %v3404_v7  ;;  %v1621_v54 = vpop.f32.mrf.mxu1  ;;  %v3373_v55 = vor.u32 %v3852_v49, %v3372_v48  ;;  %v1594_v63 = vadd.f32 %v1593_v32, %v323_v11  ;;  %v3857_v32 = vld [vmem:[#allocation8 + $0x44] sm:$0xf]  ;;  %v3855_v48 = vld [vmem:[#allocation8 + $0x34] sm:$0xf]  ;;  %v3390_v49 = vld [vmem:[#allocation8 + $0x38] sm:$0xf0] }
  0xf9   :  { %1858 = vmatmul.bf16.vlgmr.msra.gmra.mxu2 %v4103_v42  ;;  %1872 = vmatmul.bf16.vlgmr.msra.gmra.mxu3 %v4101_v41  ;;  %v1553_v42 = vpop.f32.mrf.mxu0  ;;  %v3872_v41 = vld [vmem:[#allocation8 + $0xb4] sm:$0xf0]  ;;  %v1552_v30 = vadd.f32 %v1551_v1, %v1538_v37  ;;  %v3422_v1 = vld [vmem:[#allocation8 + $0x78] sm:$0xf0]  ;;  %v3365_v7 = vor.u32 %v3850_v60, %v3364_v56  ;;  %v3417_v22 = vor.u32 %v3861_v14, %v3414_v2  ;;  %v3540_v56 = vld [vmem:[#allocation8 + $0x160] sm:$0xf] }
  0xfa   :  { %v1554_v31 = vadd.f32 %v1553_v42, %v1540_v25  ;;  %v3453_v38 = vor.u32 %v3872_v41, %v3452_v29  ;;  %v1595_v59 = vpop.f32.mrf.mxu3  ;;  %v3859_v42 = vld [vmem:[#allocation8 + $0x54] sm:$0xf]  ;;  %v3470_v29 = vld [vmem:[#allocation8 + $0xd8] sm:$0xf0]  ;;  %v3382_v60 = vld [vmem:[#allocation8 + $0x28] sm:$0xf0] }
  0xfb   :  { %2289 = vmatpush.bf16.msrb.mxu0 %v3413_v6  ;;  %v1566_v44 = vadd.f32 %v1565_v12, %v1552_v30  ;;  %v3486_v6 = vld [vmem:[#allocation8 + $0xf8] sm:$0xf0]  ;;  %v3429_v12 = vor.u32 %v3866_v53, %v3428_v3  ;;  %v1596_v24 = vadd.f32 %v1595_v59, %v323_v11  ;;  %v3853_v59 = vld [vmem:[#allocation8 + $0x24] sm:$0xf] }
  0xfc   :  { %2303 = vmatpush.bf16.msrb.mxu1 %v3477_v10  ;;  %v1568_v45 = vadd.f32 %v1567_v33, %v1554_v31  ;;  %v3425_v10 = vor.u32 %v3863_v61, %v3422_v1  ;;  %v3489_v15 = vor.u32 %v3879_v5, %v3486_v6  ;;  %v3398_v33 = vld [vmem:[#allocation8 + $0x48] sm:$0xf0]  ;;  %v3457_v61 = vor.u32 %v3871_v51, %v3454_v52  ;;  %v3532_v6 = vld [vmem:[#allocation8 + $0x150] sm:$0xf] }
  0xfd   :  { %v1580_v0 = vadd.f32 %v1579_v18, %v1566_v44  ;;  %v1635_v18 = vpop.f32.mrf.mxu2  ;;  %v3401_v40 = vor.u32 %v3857_v32, %v3398_v33  ;;  %v3896_v44 = vld [vmem:[#allocation8 + $0x174] sm:$0xf0]  ;;  %v3446_v1 = vld [vmem:[#allocation8 + $0xa8] sm:$0xf0]  ;;  %v3385_v5 = vor.u32 %v3853_v59, %v3382_v60  ;;  %v3508_v32 = vld [vmem:[#allocation8 + $0x120] sm:$0xf] }
  0xfe   :  { %v1582_v47 = vadd.f32 %v1581_v39, %v1568_v45  ;;  %v3549_v11 = vor.u32 %v3896_v44, %v3548_v43  ;;  %v3492_v44 = vld [vmem:[#allocation8 + $0x100] sm:$0xf]  ;;  %v3542_v51 = vld [vmem:[#allocation8 + $0x168] sm:$0xf0] }
  0xff   :  { %2290 = vmatpush.bf16.msrb.mxu0 %v3405_v23  ;;  %v1878_v4 = vmul.f32 0.2, %v1580_v0  ;;  %v3877_v23 = vld [vmem:[#allocation8 + $0xe4] sm:$0xf] }
 0x100   :  { %2304 = vmatpush.bf16.msrb.mxu1 %v3469_v21  ;;  %v1882_v58 = vmul.f32 0.2, %v1582_v47  ;;  %v1623_v25 = vpop.f32.mrf.mxu1  ;;  %v3481_v27 = vor.u32 %v3877_v23, %v3478_v19  ;;  %2316 = vmatpush.bf16.msrb.mxu2 %v3549_v11  ;;  %v3893_v11 = vld [vmem:[#allocation8 + $0x164] sm:$0xf] }
 0x101   :  { %v1607_v57 = vpop.f32.mrf.mxu0  ;;  %v1886_v16 = vmax.f32 %v1580_v0, %v1878_v4 }
 0x102   :  { %v1890_v8 = vmax.f32 %v1582_v47, %v1882_v58  ;;  %v1608_v13 = vadd.f32 %v1607_v57, %v1594_v63  ;;  %v1649_v9 = vpop.f32.mrf.mxu3  ;;  %v3894_v58 = vld [vmem:[#allocation8 + $0x164] sm:$0xf0]  ;;  %v3869_v63 = vld [vmem:[#allocation8 + $0xa4] sm:$0xf] }
 0x103   :  { %2291 = vmatpush.bf16.msrb.mxu0 %v3397_v26  ;;  %v3406_v26 = vld [vmem:[#allocation8 + $0x58] sm:$0xf0]  ;;  %v3449_v14 = vor.u32 %v3869_v63, %v3446_v1  ;;  %v3889_v63 = vld [vmem:[#allocation8 + $0x144] sm:$0xf] }
 0x104   :  { %2305 = vmatpush.bf16.msrb.mxu1 %v3461_v28  ;;  %v4142_v20 = vpack.c.bf16 %v1890_v8, %v1886_v16  ;;  %v1622_v37 = vadd.f32 %v1621_v54, %v1608_v13  ;;  %v3875_v28 = vld [vmem:[#allocation8 + $0xd4] sm:$0xf]  ;;  %v3409_v41 = vor.u32 %v3859_v42, %v3406_v26  ;;  %v3374_v13 = vld [vmem:[#allocation8 + $0x18] sm:$0xf0] }
 0x105   :  { %v3438_v16 = vld [vmem:[#allocation8 + $0x98] sm:$0xf0] }
 0x106   :  { %v1636_v30 = vadd.f32 %v1635_v18, %v1622_v37  ;;  %v3849_v37 = vld [vmem:[#allocation8 + $0x4] sm:$0xf] }
 0x107   :  { %2292 = vmatpush.bf16.msrb.mxu0 %v3389_v34  ;;  %v3473_v34 = vor.u32 %v3875_v28, %v3470_v29 }
 0x108   :  { %2306 = vmatpush.bf16.msrb.mxu1 %v3453_v38  ;;  %v1637_v38 = vpop.f32.mrf.mxu2  ;;  %v1650_v45 = vadd.f32 %v1649_v9, %v1636_v30  ;;  %v3430_v9 = vld [vmem:[#allocation8 + $0x88] sm:$0xf0]  ;;  %v3516_v30 = vld [vmem:[#allocation8 + $0x130] sm:$0xf] }
 0x109   :  { %v1609_v21 = vpop.f32.mrf.mxu0 }
 0x10a   :  { %v1610_v31 = vadd.f32 %v1609_v21, %v1596_v24  ;;  %v1651_v54 = vpop.f32.mrf.mxu3  ;;  %v3524_v21 = vld [vmem:[#allocation8 + $0x140] sm:$0xf] }
 0x10b   :  { %2293 = vmatpush.bf16.msrb.mxu0 %v3381_v46 }
 0x10c   :  { %2307 = vmatpush.bf16.msrb.mxu1 %v3445_v50  ;;  %v1624_v46 = vadd.f32 %v1623_v25, %v1610_v31  ;;  %v3465_v50 = vor.u32 %v3873_v35, %v3462_v36  ;;  %v3366_v25 = vld [vmem:[#allocation8 + $0x8] sm:$0xf0]  ;;  %v3888_v31 = vld [vmem:[#allocation8 + $0x134] sm:$0xf0]  ;;  %v3886_v36 = vld [vmem:[#allocation8 + $0x124] sm:$0xf0] }
 0x10d   :  { %v3517_v35 = vor.u32 %v3888_v31, %v3516_v30 }
 0x10e   :  { %v1638_v0 = vadd.f32 %v1637_v38, %v1624_v46  ;;  %v3509_v38 = vor.u32 %v3886_v36, %v3508_v32  ;;  %v3881_v36 = vld [vmem:[#allocation8 + $0x104] sm:$0xf] }
 0x10f   :  { %2294 = vmatpush.bf16.msrb.mxu0 %v3373_v55  ;;  %v3393_v55 = vor.u32 %v3855_v48, %v3390_v49  ;;  %v3550_v48 = vld [vmem:[#allocation8 + $0x178] sm:$0xf0] }
 0x110   :  { %2308 = vmatpush.bf16.msrb.mxu1 %v3437_v62  ;;  %v3541_v62 = vor.u32 %v3894_v58, %v3540_v56  ;;  %v1652_v3 = vadd.f32 %v1651_v54, %v1638_v0  ;;  %v3545_v0 = vor.u32 %v3893_v11, %v3542_v51  ;;  %v3891_v54 = vld [vmem:[#allocation8 + $0x154] sm:$0xf]  ;;  %v3534_v56 = vld [vmem:[#allocation8 + $0x158] sm:$0xf0]  ;;  %v324_v58 = vperm.slane %v4131_v17, 2 }
 0x111   :  { %v3537_v59 = vor.u32 %v3891_v54, %v3534_v56  ;;  %v3614_v56 = vld [vmem:[#allocation8 + $0x1f8] sm:$0xf0] }
 0x112   :  { %2317 = vmatpush.bf16.msrb.mxu2 %v3541_v62  ;;  %v3910_v62 = vld [vmem:[#allocation8 + $0x1e4] sm:$0xf0] }
 0x113   :  { %2295 = vmatpush.bf16.msrb.mxu0 %v3365_v7  ;;  %v3892_v7 = vld [vmem:[#allocation8 + $0x154] sm:$0xf0] }
 0x114   :  { %2309 = vmatpush.bf16.msrb.mxu1 %v3429_v12  ;;  %v1677_v47 = vpop.f32.mrf.mxu1  ;;  %v3851_v12 = vld [vmem:[#allocation8 + $0x14] sm:$0xf]  ;;  %v3533_v2 = vor.u32 %v3892_v7, %v3532_v6  ;;  %v3596_v7 = vld [vmem:[#allocation8 + $0x1d0] sm:$0xf] }
 0x115   :  { %v1663_v39 = vpop.f32.mrf.mxu0  ;;  %v3377_v19 = vor.u32 %v3851_v12, %v3374_v13  ;;  %v3518_v13 = vld [vmem:[#allocation8 + $0x138] sm:$0xf0] }
 0x116   :  { %2296 = vmatmul.bf16.vlgmr.msrb.gmra.mxu0 %v4142_v20  ;;  %v1664_v57 = vadd.f32 %v1663_v39, %v1650_v45  ;;  %2318 = vmatpush.bf16.msrb.mxu2 %v3533_v2  ;;  %v3500_v39 = vld [vmem:[#allocation8 + $0x110] sm:$0xf]  ;;  %v3882_v45 = vld [vmem:[#allocation8 + $0x104] sm:$0xf0] }
 0x117   :  { %2344 = vmatpush.bf16.msra.mxu0 %v3425_v10  ;;  %v3493_v46 = vor.u32 %v3882_v45, %v3492_v44  ;;  %v3906_v2 = vld [vmem:[#allocation8 + $0x1c4] sm:$0xf0] }
 0x118   :  { %2358 = vmatpush.bf16.msra.mxu1 %v3489_v15  ;;  %v1678_v53 = vadd.f32 %v1677_v47, %v1664_v57  ;;  %v3867_v15 = vld [vmem:[#allocation8 + $0x94] sm:$0xf]  ;;  %v3612_v57 = vld [vmem:[#allocation8 + $0x1f0] sm:$0xf] }
 0x119   :  { %v3441_v42 = vor.u32 %v3867_v15, %v3438_v16  ;;  %v3895_v47 = vld [vmem:[#allocation8 + $0x174] sm:$0xf] }
 0x11a   :  { %v1879_v18 = vmul.f32 0.2, %v1678_v53 }
 0x11b   :  { %2345 = vmatpush.bf16.msra.mxu0 %v3417_v22  ;;  %v3890_v22 = vld [vmem:[#allocation8 + $0x144] sm:$0xf0] }
 0x11c   :  { %2359 = vmatpush.bf16.msra.mxu1 %v3481_v27  ;;  %v1679_v10 = vpop.f32.mrf.mxu1  ;;  %v3525_v26 = vor.u32 %v3890_v22, %v3524_v21  ;;  %v3865_v27 = vld [vmem:[#allocation8 + $0x84] sm:$0xf]  ;;  %v1887_v28 = vmax.f32 %v1678_v53, %v1879_v18  ;;  %v1691_v49 = vpop.f32.mrf.mxu2  ;;  %v3526_v53 = vld [vmem:[#allocation8 + $0x148] sm:$0xf0] }
 0x11d   :  { %v1665_v4 = vpop.f32.mrf.mxu0  ;;  %v1705_v52 = vpop.f32.mrf.mxu3  ;;  %v3885_v18 = vld [vmem:[#allocation8 + $0x124] sm:$0xf] }
 0x11e   :  { %v1666_v8 = vadd.f32 %v1665_v4, %v1652_v3  ;;  %2319 = vmatpush.bf16.msrb.mxu2 %v3525_v26  ;;  %v1692_v4 = vadd.f32 %v1691_v49, %v324_v58  ;;  %v3883_v26 = vld [vmem:[#allocation8 + $0x114] sm:$0xf]  ;;  %v3900_v49 = vld [vmem:[#allocation8 + $0x194] sm:$0xf0] }
 0x11f   :  { %2346 = vmatpush.bf16.msra.mxu0 %v3409_v41  ;;  %v3369_v41 = vor.u32 %v3849_v37, %v3366_v25  ;;  %v3580_v37 = vld [vmem:[#allocation8 + $0x1b0] sm:$0xf]  ;;  %v3904_v25 = vld [vmem:[#allocation8 + $0x1b4] sm:$0xf0] }
 0x120   :  { %2360 = vmatpush.bf16.msra.mxu1 %v3473_v34  ;;  %v1680_v23 = vadd.f32 %v1679_v10, %v1666_v8  ;;  %v3433_v34 = vor.u32 %v3865_v27, %v3430_v9  ;;  %v3908_v8 = vld [vmem:[#allocation8 + $0x1d4] sm:$0xf0]  ;;  %v3887_v10 = vld [vmem:[#allocation8 + $0x134] sm:$0xf]  ;;  %v1706_v15 = vadd.f32 %v1705_v52, %v1692_v4  ;;  %v3502_v27 = vld [vmem:[#allocation8 + $0x118] sm:$0xf0] }
 0x121   :  { %v3597_v12 = vor.u32 %v3908_v8, %v3596_v7  ;;  %v3521_v16 = vor.u32 %v3887_v10, %v3518_v13  ;;  %v3505_v30 = vor.u32 %v3883_v26, %v3502_v27  ;;  %v3907_v7 = vld [vmem:[#allocation8 + $0x1d4] sm:$0xf]  ;;  %v3598_v8 = vld [vmem:[#allocation8 + $0x1d8] sm:$0xf0] }
 0x122   :  { %v1883_v24 = vmul.f32 0.2, %v1680_v23  ;;  %2320 = vmatpush.bf16.msrb.mxu2 %v3517_v35  ;;  %v3902_v35 = vld [vmem:[#allocation8 + $0x1a4] sm:$0xf0] }
 0x123   :  { %2347 = vmatpush.bf16.msra.mxu0 %v3401_v40  ;;  %v3884_v40 = vld [vmem:[#allocation8 + $0x114] sm:$0xf0] }
 0x124   :  { %2361 = vmatpush.bf16.msra.mxu1 %v3465_v50  ;;  %v1891_v29 = vmax.f32 %v1680_v23, %v1883_v24  ;;  %v3501_v43 = vor.u32 %v3884_v40, %v3500_v39  ;;  %v3553_v50 = vor.u32 %v3895_v47, %v3550_v48  ;;  %v1693_v60 = vpop.f32.mrf.mxu2  ;;  %v3510_v23 = vld [vmem:[#allocation8 + $0x128] sm:$0xf0]  ;;  %v3564_v48 = vld [vmem:[#allocation8 + $0x190] sm:$0xf] }
 0x125   :  { %v1707_v6 = vpop.f32.mrf.mxu3  ;;  %v1694_v22 = vadd.f32 %v1693_v60, %v324_v58  ;;  %v3513_v24 = vor.u32 %v3885_v18, %v3510_v23  ;;  %v3494_v40 = vld [vmem:[#allocation8 + $0x108] sm:$0xf0]  ;;  %v3903_v23 = vld [vmem:[#allocation8 + $0x1b4] sm:$0xf] }
 0x126   :  { %v1895_v33 = vpack.c.bf16 %v1891_v29, %v1887_v28  ;;  %2321 = vmatpush.bf16.msrb.mxu2 %v3509_v38  ;;  %v3581_v29 = vor.u32 %v3904_v25, %v3580_v37  ;;  %v3497_v44 = vor.u32 %v3881_v36, %v3494_v40  ;;  %v3901_v37 = vld [vmem:[#allocation8 + $0x1a4] sm:$0xf]  ;;  %v3574_v25 = vld [vmem:[#allocation8 + $0x1a8] sm:$0xf0] }
 0x127   :  { %2348 = vmatpush.bf16.msra.mxu0 %v3393_v55  ;;  %v3577_v26 = vor.u32 %v3901_v37, %v3574_v25  ;;  %v3558_v36 = vld [vmem:[#allocation8 + $0x188] sm:$0xf0] }
 0x128   :  { %2362 = vmatpush.bf16.msra.mxu1 %v3457_v61  ;;  %v3604_v61 = vld [vmem:[#allocation8 + $0x1e0] sm:$0xf] }
 0x129   :  { %2310 = vmatmul.bf16.vlgmr.msrb.gmra.mxu1 %v1895_v33  ;;  %v3605_v3 = vor.u32 %v3910_v62, %v3604_v61 }
 0x12a   :  { %2322 = vmatpush.bf16.msrb.mxu2 %v3501_v43 }
 0x12b   :  { %2349 = vmatpush.bf16.msra.mxu0 %v3385_v5  ;;  %v3529_v5 = vor.u32 %v3889_v63, %v3526_v53  ;;  %v3909_v63 = vld [vmem:[#allocation8 + $0x1e4] sm:$0xf] }
 0x12c   :  { %2363 = vmatpush.bf16.msra.mxu1 %v3449_v14  ;;  %v3588_v14 = vld [vmem:[#allocation8 + $0x1c0] sm:$0xf] }
 0x12d   :  { %v3589_v21 = vor.u32 %v3906_v2, %v3588_v14  ;;  %v3905_v14 = vld [vmem:[#allocation8 + $0x1c4] sm:$0xf]  ;;  %v3590_v2 = vld [vmem:[#allocation8 + $0x1c8] sm:$0xf0] }
 0x12e   :  { %2323 = vmatpush.bf16.msrb.mxu2 %v3493_v46  ;;  %v3593_v18 = vor.u32 %v3905_v14, %v3590_v2 }
 0x12f   :  { %2350 = vmatpush.bf16.msra.mxu0 %v3377_v19 }
 0x130   :  { %2364 = vmatpush.bf16.msra.mxu1 %v3441_v42 }
 0x132   :  { %2372 = vmatpush.bf16.msra.mxu2 %v3553_v50  ;;  %v3565_v50 = vor.u32 %v3900_v49, %v3564_v48 }
 0x133   :  { %2351 = vmatpush.bf16.msra.mxu0 %v3369_v41  ;;  %v1708_v41 = vadd.f32 %v1707_v6, %v1694_v22 }
 0x134   :  { %2365 = vmatpush.bf16.msra.mxu1 %v3433_v34  ;;  %v1733_v19 = vpop.f32.mrf.mxu1  ;;  %v3572_v34 = vld [vmem:[#allocation8 + $0x1a0] sm:$0xf] }
 0x135   :  { %v1719_v1 = vpop.f32.mrf.mxu0  ;;  %v3573_v39 = vor.u32 %v3902_v35, %v3572_v34  ;;  %v3897_v35 = vld [vmem:[#allocation8 + $0x184] sm:$0xf] }
 0x136   :  { %2352 = vmatmul.bf16.vlgmr.msra.gmra.mxu0 %v4142_v20  ;;  %2373 = vmatpush.bf16.msra.mxu2 %v3545_v0  ;;  %v3912_v20 = vld [vmem:[#allocation8 + $0x1f4] sm:$0xf0]  ;;  %v1720_v9 = vadd.f32 %v1719_v1, %v1706_v15  ;;  %v3606_v1 = vld [vmem:[#allocation8 + $0x1e8] sm:$0xf0]  ;;  %v325_v15 = vperm.slane %v4131_v17, 3 }
 0x137   :  { %v3613_v55 = vor.u32 %v3912_v20, %v3612_v57  ;;  %v3556_v57 = vld [vmem:[#allocation8 + $0x180] sm:$0xf]  ;;  %v3898_v20 = vld [vmem:[#allocation8 + $0x184] sm:$0xf0]  ;;  %v3609_v53 = vor.u32 %v3909_v63, %v3606_v1 }
 0x138   :  { %v1734_v32 = vadd.f32 %v1733_v19, %v1720_v9  ;;  %v3557_v54 = vor.u32 %v3898_v20, %v3556_v57  ;;  %v3582_v19 = vld [vmem:[#allocation8 + $0x1b8] sm:$0xf0]  ;;  %v3899_v9 = vld [vmem:[#allocation8 + $0x194] sm:$0xf] }
 0x139   :  { %2366 = vmatmul.bf16.vlgmr.msra.gmra.mxu1 %v1895_v33  ;;  %2330 = vmatpush.bf16.msrb.mxu3 %v3613_v55  ;;  %v3911_v55 = vld [vmem:[#allocation8 + $0x1f4] sm:$0xf]  ;;  %v3585_v22 = vor.u32 %v3903_v23, %v3582_v19 }
 0x13a   :  { %2374 = vmatpush.bf16.msra.mxu2 %v3537_v59  ;;  %v3617_v59 = vor.u32 %v3911_v55, %v3614_v56 }
 0x13c   :  { %v1747_v42 = vpop.f32.mrf.mxu2  ;;  %v1761_v31 = vpop.f32.mrf.mxu3 }
 0x13d   :  { %2331 = vmatpush.bf16.msrb.mxu3 %v3605_v3  ;;  %v1721_v28 = vpop.f32.mrf.mxu0  ;;  %v1735_v38 = vpop.f32.mrf.mxu1  ;;  %v1748_v43 = vadd.f32 %v1747_v42, %v1734_v32 }
 0x13e   :  { %2375 = vmatpush.bf16.msra.mxu2 %v3529_v5  ;;  %v1722_v33 = vadd.f32 %v1721_v28, %v1708_v41  ;;  %v3566_v28 = vld [vmem:[#allocation8 + $0x198] sm:$0xf0] }
 0x13f   :  { %v1762_v11 = vadd.f32 %v1761_v31, %v1748_v43  ;;  %v3569_v17 = vor.u32 %v3899_v9, %v3566_v28 }
 0x140   :  { %v1736_v47 = vadd.f32 %v1735_v38, %v1722_v33  ;;  %v3561_v38 = vor.u32 %v3897_v35, %v3558_v36 }
 0x141   :  { %2332 = vmatpush.bf16.msrb.mxu3 %v3597_v12  ;;  %v3601_v12 = vor.u32 %v3907_v7, %v3598_v8 }
 0x142   :  { %2376 = vmatpush.bf16.msra.mxu2 %v3521_v16 }
 0x144   :  { %v1749_v45 = vpop.f32.mrf.mxu2  ;;  %v1763_v52 = vpop.f32.mrf.mxu3 }
 0x145   :  { %2333 = vmatpush.bf16.msrb.mxu3 %v3589_v21  ;;  %v1750_v51 = vadd.f32 %v1749_v45, %v1736_v47 }
 0x146   :  { %2377 = vmatpush.bf16.msra.mxu2 %v3513_v24 }
 0x147   :  { %v1764_v58 = vadd.f32 %v1763_v52, %v1750_v51 }
 0x149   :  { %2334 = vmatpush.bf16.msrb.mxu3 %v3581_v29 }
 0x14a   :  { %2378 = vmatpush.bf16.msra.mxu2 %v3505_v30 }
 0x14d   :  { %2335 = vmatpush.bf16.msrb.mxu3 %v3573_v39 }
 0x14e   :  { %2379 = vmatpush.bf16.msra.mxu2 %v3497_v44 }
 0x151   :  { %2336 = vmatpush.bf16.msrb.mxu3 %v3565_v50 }
 0x154   :  { %v1789_v6 = vpop.f32.mrf.mxu1 }
 0x155   :  { %v1775_v46 = vpop.f32.mrf.mxu0  ;;  %2337 = vmatpush.bf16.msrb.mxu3 %v3557_v54  ;;  %v1790_v21 = vadd.f32 %v1789_v6, %v325_v15 }
 0x156   :  { %v1776_v0 = vadd.f32 %v1775_v46, %v1762_v11 }
 0x158   :  { %v1880_v61 = vmul.f32 0.2, %v1776_v0 }
 0x159   :  { %2386 = vmatpush.bf16.msra.mxu3 %v3617_v59 }
 0x15a   :  { %v1888_v4 = vmax.f32 %v1776_v0, %v1880_v61 }
 0x15c   :  { %v1803_v13 = vpop.f32.mrf.mxu2  ;;  %v1817_v16 = vpop.f32.mrf.mxu3 }
 0x15d   :  { %v1777_v60 = vpop.f32.mrf.mxu0  ;;  %2387 = vmatpush.bf16.msra.mxu3 %v3609_v53  ;;  %v1791_v24 = vpop.f32.mrf.mxu1  ;;  %v1804_v42 = vadd.f32 %v1803_v13, %v1790_v21 }
 0x15e   :  { %v1778_v62 = vadd.f32 %v1777_v60, %v1764_v58  ;;  %v1792_v29 = vadd.f32 %v1791_v24, %v325_v15 }
 0x15f   :  { %v1818_v31 = vadd.f32 %v1817_v16, %v1804_v42 }
 0x160   :  { %v1884_v3 = vmul.f32 0.2, %v1778_v62 }
 0x161   :  { %2388 = vmatpush.bf16.msra.mxu3 %v3601_v12 }
 0x162   :  { %v1892_v5 = vmax.f32 %v1778_v62, %v1884_v3  ;;  %v1962_v62 = vld [vmem:[%s4167_s4] sm:$0x3] }
 0x163   :  { %v1964_v53 = vperm.slane %v1962_v62, 0  ;;  %v1965_v7 = vperm.slane %v1962_v62, 1 }
 0x164   :  { %v1896_v10 = vpack.c.bf16 %v1892_v5, %v1888_v4  ;;  %v1805_v27 = vpop.f32.mrf.mxu2  ;;  %v1819_v41 = vpop.f32.mrf.mxu3 }
 0x165   :  { %2389 = vmatpush.bf16.msra.mxu3 %v3593_v18  ;;  %v1806_v33 = vadd.f32 %v1805_v27, %v1792_v29 }
 0x166   :  { %2324 = vmatmul.bf16.vlgmr.msrb.gmra.mxu2 %v1896_v10 }
 0x167   :  { %v1820_v40 = vadd.f32 %v1819_v41, %v1806_v33 }
 0x169   :  { %2390 = vmatpush.bf16.msra.mxu3 %v3585_v22  ;;  %v2408_v22 = vld [vmem:[%s4168_s5] sm:$0x3] }
 0x16a   :  { %v2410_v27 = vperm.slane %v2408_v22, 0  ;;  %v2411_v41 = vperm.slane %v2408_v22, 1 }
 0x16d   :  { %2391 = vmatpush.bf16.msra.mxu3 %v3577_v26 }
 0x171   :  { %2392 = vmatpush.bf16.msra.mxu3 %v3569_v17 }
 0x174   :  { %v1845_v32 = vpop.f32.mrf.mxu1 }
 0x175   :  { %v1831_v30 = vpop.f32.mrf.mxu0  ;;  %2393 = vmatpush.bf16.msra.mxu3 %v3561_v38 }
 0x176   :  { %v1832_v34 = vadd.f32 %v1831_v30, %v1818_v31  ;;  %2380 = vmatmul.bf16.vlgmr.msra.gmra.mxu2 %v1896_v10 }
 0x178   :  { %v1846_v43 = vadd.f32 %v1845_v32, %v1832_v34 }
 0x17c   :  { %v1859_v39 = vpop.f32.mrf.mxu2  ;;  %v1873_v44 = vpop.f32.mrf.mxu3 }
 0x17d   :  { %v1833_v45 = vpop.f32.mrf.mxu0  ;;  %v1860_v46 = vadd.f32 %v1859_v39, %v1846_v43  ;;  %v1847_v48 = vpop.f32.mrf.mxu1 }
 0x17e   :  { %v1834_v47 = vadd.f32 %v1833_v45, %v1820_v40 }
 0x17f   :  { %v1874_v49 = vadd.f32 %v1873_v44, %v1860_v46 }
 0x180   :  { %v1848_v50 = vadd.f32 %v1847_v48, %v1834_v47  ;;  %v2425_v48 = vstv %s4169_s6 }
 0x181   :  { %v1881_v0 = vmul.f32 0.2, %v1874_v49 }
 0x183   :  { %v1889_v54 = vmax.f32 %v1874_v49, %v1881_v0 }
 0x184   :  { %v1861_v11 = vpop.f32.mrf.mxu2  ;;  %v1875_v52 = vpop.f32.mrf.mxu3 }
 0x185   :  { %v1862_v51 = vadd.f32 %v1861_v11, %v1848_v50 }
 0x187   :  { %v1876_v57 = vadd.f32 %v1875_v52, %v1862_v51 }
 0x189   :  { %v1885_v20 = vmul.f32 0.2, %v1876_v57 }
 0x18b   :  { %v1893_v55 = vmax.f32 %v1876_v57, %v1885_v20 }
 0x18d   :  { %v1897_v56 = vpack.c.bf16 %v1893_v55, %v1889_v54 }
 0x18f   :  { %2338 = vmatmul.bf16.vlgmr.msrb.gmra.mxu3 %v1897_v56 }
 0x193   :  { %v2297_v58 = vpop.f32.mrf.mxu0 }
 0x194   :  { %v2298_v4 = vadd.f32 %v2297_v58, %v1964_v53 }
 0x19b   :  { %v2299_v61 = vpop.f32.mrf.mxu0 }
 0x19c   :  { %v2300_v15 = vadd.f32 %v2299_v61, %v1964_v53 }
 0x19f   :  { %2394 = vmatmul.bf16.vlgmr.msra.gmra.mxu3 %v1897_v56 }
 0x1a6   :  { %v2311_v59 = vpop.f32.mrf.mxu1 }
 0x1a7   :  { %v2312_v6 = vadd.f32 %v2311_v59, %v2298_v4 }
 0x1ae   :  { %v2313_v63 = vpop.f32.mrf.mxu1 }
 0x1af   :  { %v2314_v18 = vadd.f32 %v2313_v63, %v2300_v15 }
 0x1b3   :  { %v2353_v5 = vpop.f32.mrf.mxu0 }
 0x1b4   :  { %v2354_v14 = vadd.f32 %v2353_v5, %v1965_v7 }
 0x1b6   :  { %v2367_v8 = vpop.f32.mrf.mxu1 }
 0x1b7   :  { %v2368_v16 = vadd.f32 %v2367_v8, %v2354_v14 }
 0x1bb   :  { %v2355_v23 = vpop.f32.mrf.mxu0 }
 0x1bc   :  { %v2356_v42 = vadd.f32 %v2355_v23, %v1965_v7 }
 0x1be   :  { %v2369_v26 = vpop.f32.mrf.mxu1 }
 0x1bf   :  { %v2370_v17 = vadd.f32 %v2369_v26, %v2356_v42 }
 0x1e9   :  { %v2325_v60 = vpop.f32.mrf.mxu2 }
 0x1ea   :  { %v2326_v12 = vadd.f32 %v2325_v60, %v2312_v6 }
 0x1f1   :  { %v2327_v1 = vpop.f32.mrf.mxu2 }
 0x1f2   :  { %v2328_v37 = vadd.f32 %v2327_v1, %v2314_v18 }
 0x1f9   :  { %v2381_v13 = vpop.f32.mrf.mxu2 }
 0x1fa   :  { %v2382_v19 = vadd.f32 %v2381_v13, %v2368_v16 }
 0x201   :  { %v2383_v30 = vpop.f32.mrf.mxu2 }
 0x202   :  { %v2384_v32 = vadd.f32 %v2383_v30, %v2370_v17 }
 0x212   :  { %v2339_v3 = vpop.f32.mrf.mxu3 }
 0x213   :  { %v2340_v2 = vadd.f32 %v2339_v3, %v2326_v12 }
 0x215   :  { %v2400_v21 = vmul.f32 0.2, %v2340_v2 }
 0x217   :  { %v2404_v9 = vmax.f32 %v2340_v2, %v2400_v21 }
 0x219   :  { %v2414_v34 = vmul.f32 %v2410_v27, %v2404_v9 }
 0x21a   :  { %v2341_v10 = vpop.f32.mrf.mxu3 }
 0x21b   :  { %v2342_v28 = vadd.f32 %v2341_v10, %v2328_v37 }
 0x21d   :  { %v2402_v33 = vmul.f32 0.2, %v2342_v28 }
 0x21f   :  { %v2406_v40 = vmax.f32 %v2342_v28, %v2402_v33 }
 0x221   :  { %v2416_v45 = vmul.f32 %v2410_v27, %v2406_v40 }
 0x222   :  { %v2395_v24 = vpop.f32.mrf.mxu3 }
 0x223   :  { %v2396_v25 = vadd.f32 %v2395_v24, %v2382_v19 }
 0x225   :  { %v2401_v29 = vmul.f32 0.2, %v2396_v25 }
 0x227   :  { %v2405_v31 = vmax.f32 %v2396_v25, %v2401_v29 }
 0x229   :  { %v2415_v35 = vmul.f32 %v2411_v41, %v2405_v31 }
 0x22a   :  { %v2397_v36 = vpop.f32.mrf.mxu3 }
 0x22b   :  { %v2398_v38 = vadd.f32 %v2397_v36, %v2384_v32  ;;  %v2418_v39 = vadd.f32 %v2415_v35, %v2414_v34 }
 0x22d   :  { %v2403_v43 = vmul.f32 0.2, %v2398_v38  ;;  %2419 = vadd.xlane.f32.xlu0 %v2418_v39 }
 0x22f   :  { %v2407_v44 = vmax.f32 %v2398_v38, %v2403_v43 }
 0x231   :  { %v2417_v46 = vmul.f32 %v2411_v41, %v2407_v44 }
 0x233   :  { %v2421_v47 = vadd.f32 %v2417_v46, %v2416_v45 }
 0x235   :  { %2422 = vadd.xlane.f32.xlu0 %v2421_v47 }
 0x2a0   :  { %v2420_v49 = vpop.xlane.xlu0 %2419 }
 0x2a1   :  { %v2426_v50 = vadd.f32 %v2425_v48, %v2420_v49 }
 0x2a3   :  { %2429 = vst.msk [vmem:[%s4170_s7] sm:$0xff] %vm2428_vm0, %v2426_v50 }
 0x2a8   :  { %v2423_v11 = vpop.xlane.xlu0 %2422 }
 0x2a9   :  { %v2427_v51 = vadd.f32 %v2425_v48, %v2423_v11 }
 0x2ab   :  { %2430 = vst.msk [vmem:[%s4170_s7 + $0x8] sm:$0xff] %vm2428_vm0, %v2427_v51 }
 0x2ac   :  { %2435 = vsyncpa [#allocation4], 1 }
 0x2ad   :  { %2436 = vsyncpa [#allocation6], 1 }
 0x2ae   :  { %2437 = vsyncpa [#allocation9], 1 }

</bundles_post_ra>
